<compile_context>
chip_gen: v7x
topology: tpu7x:2x2x1
jax: 0.10.0
libtpu: 0.0.40
codegen_flags: <defaults>
</compile_context>

<pallas_src>
import functools

import jax
import jax.numpy as jnp
from jax import lax
from jax.experimental import pallas as pl
from jax.experimental.pallas import tpu as pltpu

# ---- config (stand-in for the `c` module referenced in the PyTorch code) ----
VOCAB_SIZE = 50
EMBEDDING_DIM = 32
LSTM_HIDDEN_DIM = 32
LSTM_STACK_LAYERS = 1
BI_DIRECTION = 2


# ----------------------------- Pallas kernel ---------------------------------
def _bilstm_encoder_kernel(idx_ref, p_ref, whh_ref, out_ref, hn_ref):
    """Fused embedding + input projection + bidirectional LSTM recurrence.

    idx_ref: (T*B, 1) int32   time-major token ids (forward time order)
    p_ref:   (Vp, 8H) f32     [emb @ Wih_f^T + b_f | emb @ Wih_b^T + b_b]
    whh_ref: (2H, 8H) f32     block-diag [[Whh_f^T, 0], [0, Whh_b^T]]
    out_ref: (T, B, 2H) f32   per-timestep hidden, lanes [0:H]=fwd, [H:2H]=bwd
    hn_ref:  (B, 2H) f32      final hidden [h_f_last | h_b_last]
    """
    TB = idx_ref.shape[0]
    Vp = p_ref.shape[0]
    H8 = p_ref.shape[1]          # 8H
    H4 = H8 // 2                 # 4H
    H = H4 // 4
    T = out_ref.shape[0]
    B = out_ref.shape[1]

    # Embedding lookup + input projection + bias for BOTH directions and the
    # whole sequence in a single lane-dense matmul (Vp is a multiple of 128).
    onehot = (idx_ref[...] ==
              lax.broadcasted_iota(jnp.int32, (TB, Vp), 1)).astype(jnp.float32)
    xproj = jnp.dot(onehot, p_ref[...],
                    preferred_element_type=jnp.float32)          # (T*B, 8H)

    def cell(g_sig, g_tanh, c):
        # gates are ordered (i, f, g, o), PyTorch convention.
        i = g_sig[:, 0:H]
        f = g_sig[:, H:2 * H]
        g = g_tanh[:, 2 * H:3 * H]
        o = g_sig[:, 3 * H:4 * H]
        c_new = f * c + i * g
        h_new = o * jnp.tanh(c_new)
        return h_new, c_new

    h_f = jnp.zeros((B, H), jnp.float32)
    c_f = jnp.zeros((B, H), jnp.float32)
    h_b = jnp.zeros((B, H), jnp.float32)
    c_b = jnp.zeros((B, H), jnp.float32)

    # T is small and static -> fully unrolled straight-line recurrence so the
    # LLO scheduler sees across timesteps and h/c stay vreg-resident.
    for t in range(T):
        tb = T - 1 - t
        # x-projection for fwd at time t and bwd at time T-1-t (bias folded in).
        gx = jnp.concatenate([xproj[t * B:(t + 1) * B, 0:H4],
                              xproj[tb * B:(tb + 1) * B, H4:H8]], axis=-1)
        if t == 0:
            gates = gx                                           # h == 0
        else:
            h_cat = jnp.concatenate([h_f, h_b], axis=-1)          # (B, 2H)
            rec = jnp.dot(h_cat, whh_ref[...],
                          preferred_element_type=jnp.float32)     # (B, 8H)
            gates = gx + rec
        sig = jax.nn.sigmoid(gates)   # full-width EUP work, sliced afterwards
        th = jnp.tanh(gates)
        h_f, c_f = cell(sig[:, 0:H4], th[:, 0:H4], c_f)
        h_b, c_b = cell(sig[:, H4:H8], th[:, H4:H8], c_b)
        out_ref[t, :, 0:H] = h_f
        out_ref[tb, :, H:2 * H] = h_b

    hn_ref[...] = jnp.concatenate([h_f, h_b], axis=-1)


# ------------------------------ wrapper --------------------------------------
def lstm_encoder_forward(index_text, params):
    """Full LSTM_ENCODER.forward.

    index_text: (B, T) int32 token ids.
    Returns (words_feature (B, 2H, T), sent_feature (B*L, 2H)).
    """
    assert LSTM_STACK_LAYERS == 1
    # TODO(synk): LSTM_STACK_LAYERS > 1 would chain a second fused kernel whose
    # input is the (T, B, 2H) feature instead of token ids.
    B, T = index_text.shape
    H = LSTM_HIDDEN_DIM
    table = params["embedding"]                       # (V, E)
    V, E = table.shape
    Vp = ((V + 127) // 128) * 128                     # lane-dense one-hot width

    w_ih_f, w_hh_f, b_ih_f, b_hh_f = params["lstm"][0]["fwd"]
    w_ih_b, w_hh_b, b_ih_b, b_hh_b = params["lstm"][0]["bwd"]

    # Fold embedding + input projection + both biases into one (Vp, 8H) table.
    table_p = jnp.zeros((Vp, E), jnp.float32).at[:V].set(table)
    p_f = table_p @ w_ih_f.T + (b_ih_f + b_hh_f)      # (Vp, 4H)
    p_b = table_p @ w_ih_b.T + (b_ih_b + b_hh_b)      # (Vp, 4H)
    p_tab = jnp.concatenate([p_f, p_b], axis=1)       # (Vp, 8H)

    # Block-diagonal recurrent weights: both directions share one matmul/step.
    whh = jnp.zeros((2 * H, 8 * H), jnp.float32)
    whh = whh.at[0:H, 0:4 * H].set(w_hh_f.T)
    whh = whh.at[H:2 * H, 4 * H:8 * H].set(w_hh_b.T)

    # time-major flattened ids: row t*B + b  ->  token at (b, t)
    idx_tm = jnp.transpose(index_text).reshape(T * B, 1).astype(jnp.int32)

    out, hn = pl.pallas_call(
        _bilstm_encoder_kernel,
        out_shape=(jax.ShapeDtypeStruct((T, B, 2 * H), jnp.float32),
                   jax.ShapeDtypeStruct((B, 2 * H), jnp.float32)),
        in_specs=[pl.BlockSpec(memory_space=pltpu.MemorySpace.VMEM)] * 3,
        out_specs=(pl.BlockSpec(memory_space=pltpu.MemorySpace.VMEM),
                   pl.BlockSpec(memory_space=pltpu.MemorySpace.VMEM)),
    )(idx_tm, p_tab, whh)

    # self.drop / inter-layer dropout -> identity (eval mode)
    words_feature = jnp.transpose(out, (1, 2, 0))     # (B, 2H, T)
    sent_feature = hn                                 # (B*L, 2H) with L == 1
    return words_feature, sent_feature


# --------------------------- parameter creation -------------------------------
def make_params(key):
    # embedding.weight.data.uniform_(-0.1, -0.1) fills the table with -0.1.
    embedding = jnp.full((VOCAB_SIZE, EMBEDDING_DIM), -0.1, dtype=jnp.float32)

    H = LSTM_HIDDEN_DIM
    bound = 1.0 / jnp.sqrt(H)
    lstm = []
    for layer in range(LSTM_STACK_LAYERS):
        in_dim = EMBEDDING_DIM if layer == 0 else 2 * H
        layer_p = {}
        for name in ("fwd", "bwd"):
            key, k1, k2, k3, k4 = jax.random.split(key, 5)
            w_ih = jax.random.uniform(k1, (4 * H, in_dim), jnp.float32,
                                      -bound, bound)
            w_hh = jax.random.uniform(k2, (4 * H, H), jnp.float32,
                                      -bound, bound)
            b_ih = jax.random.uniform(k3, (4 * H,), jnp.float32, -bound, bound)
            b_hh = jax.random.uniform(k4, (4 * H,), jnp.float32, -bound, bound)
            layer_p[name] = (w_ih, w_hh, b_ih, b_hh)
        lstm.append(layer_p)
    return {"embedding": embedding, "lstm": lstm}


# ------------------------------ pure-JAX reference ----------------------------
def _ref_lstm_dir(x, w_ih, w_hh, b_ih, b_hh):
    T, B, _ = x.shape
    H = w_hh.shape[1]

    def step(carry, x_t):
        h, c = carry
        g = x_t @ w_ih.T + h @ w_hh.T + b_ih + b_hh
        i = jax.nn.sigmoid(g[:, :H])
        f = jax.nn.sigmoid(g[:, H:2 * H])
        gg = jnp.tanh(g[:, 2 * H:3 * H])
        o = jax.nn.sigmoid(g[:, 3 * H:])
        c = f * c + i * gg
        h = o * jnp.tanh(c)
        return (h, c), h

    (h, _), ys = lax.scan(step, (jnp.zeros((B, H), jnp.float32),
                                 jnp.zeros((B, H), jnp.float32)), x)
    return ys, h


def reference_forward(index_text, params):
    B, T = index_text.shape
    emb = params["embedding"][index_text]             # (B, T, E)
    x = jnp.transpose(emb, (1, 0, 2))
    h_list = []
    for layer in range(LSTM_STACK_LAYERS):
        out_f, h_f = _ref_lstm_dir(x, *params["lstm"][layer]["fwd"])
        out_b_rev, h_b = _ref_lstm_dir(x[::-1], *params["lstm"][layer]["bwd"])
        x = jnp.concatenate([out_f, out_b_rev[::-1]], axis=-1)
        h_list += [h_f, h_b]
    output = jnp.transpose(x, (1, 0, 2))
    words_feature = jnp.transpose(output, (0, 2, 1))
    h_n = jnp.stack(h_list, axis=0)
    sent_feature = jnp.transpose(h_n, (1, 0, 2)).reshape(
        -1, LSTM_HIDDEN_DIM * BI_DIRECTION)
    return words_feature, sent_feature


# ------------------------------------ main ------------------------------------
if __name__ == "__main__":
    key = jax.random.PRNGKey(0)
    k_idx, k_par = jax.random.split(key)

    B, T = 2, 8
    index_text = jax.random.randint(k_idx, (B, T), 0, VOCAB_SIZE,
                                    dtype=jnp.int32)
    params = make_params(k_par)

    forward = jax.jit(lstm_encoder_forward)
    words_feature, sent_feature = forward(index_text, params)
    jax.block_until_ready((words_feature, sent_feature))

    # sanity check against a pure-JAX reference
    ref_w, ref_s = reference_forward(index_text, params)
    assert words_feature.shape == (B, BI_DIRECTION * LSTM_HIDDEN_DIM, T)
    assert sent_feature.shape == (B * LSTM_STACK_LAYERS,
                                  BI_DIRECTION * LSTM_HIDDEN_DIM)
    assert jnp.allclose(words_feature, ref_w, atol=1e-3, rtol=1e-3)
    assert jnp.allclose(sent_feature, ref_s, atol=1e-3, rtol=1e-3)

    print("KERNEL_OK")
</pallas_src>

<mosaic_0001>
module attributes {stable_mosaic.version = 11 : i64} {
  func.func @_bilstm_encoder_kernel(%arg0: memref<16x1xi32, #tpu.memory_space<vmem>>, %arg1: memref<128x256xf32, #tpu.memory_space<vmem>>, %arg2: memref<64x256xf32, #tpu.memory_space<vmem>>, %arg3: memref<8x2x64xf32, #tpu.memory_space<vmem>>, %arg4: memref<2x64xf32, #tpu.memory_space<vmem>>) attributes {dimension_semantics = [], scalar_prefetch = 0 : i64, scratch_operands = 0 : i64, tpu.core_type = #tpu.core_type<tc>} {
    %c0 = arith.constant 0 : index
    %c0_0 = arith.constant 0 : index
    %0 = vector.load %arg0[%c0, %c0_0] : memref<16x1xi32, #tpu.memory_space<vmem>>, vector<16x1xi32>
    %1 = tpu.iota {dimensions = array<i32: 1>} : vector<16x128xi32>
    %2 = vector.broadcast %0 : vector<16x1xi32> to vector<16x128xi32>
    %3 = arith.cmpi eq, %2, %1 : vector<16x128xi32>
    %4 = arith.extui %3 : vector<16x128xi1> to vector<16x128xi32>
    %5 = arith.sitofp %4 : vector<16x128xi32> to vector<16x128xf32>
    %c0_1 = arith.constant 0 : index
    %c0_2 = arith.constant 0 : index
    %6 = vector.load %arg1[%c0_1, %c0_2] : memref<128x256xf32, #tpu.memory_space<vmem>>, vector<128x256xf32>
    %cst = arith.constant dense<0.000000e+00> : vector<16x256xf32>
    %7 = tpu.matmul %5, %6, %cst {dimension_numbers = #tpu.dot_dimension_numbers<[1], [0], [0], [1], [0, 0, 1, 1], [], []>} : vector<16x128xf32>, vector<128x256xf32>, vector<16x256xf32> -> vector<16x256xf32>
    %cst_3 = arith.constant 0.000000e+00 : f32
    %8 = vector.broadcast %cst_3 : f32 to vector<2x32xf32>
    %cst_4 = arith.constant 0.000000e+00 : f32
    %9 = vector.broadcast %cst_4 : f32 to vector<2x32xf32>
    %10 = vector.extract_strided_slice %7 {offsets = [0, 0], sizes = [2, 128], strides = [1, 1]} : vector<16x256xf32> to vector<2x128xf32>
    %11 = vector.extract_strided_slice %7 {offsets = [14, 128], sizes = [2, 128], strides = [1, 1]} : vector<16x256xf32> to vector<2x128xf32>
    %12 = tpu.concatenate %10, %11 in 1 : vector<2x128xf32>, vector<2x128xf32> -> vector<2x256xf32>
    %13 = arith.negf %12 : vector<2x256xf32>
    %14 = math.exp %13 : vector<2x256xf32>
    %cst_5 = arith.constant 1.000000e+00 : f32
    %15 = vector.broadcast %cst_5 : f32 to vector<2x256xf32>
    %16 = arith.addf %15, %14 : vector<2x256xf32>
    %17 = arith.divf %15, %16 : vector<2x256xf32>
    %18 = math.tanh %12 : vector<2x256xf32>
    %19 = vector.extract_strided_slice %17 {offsets = [0, 0], sizes = [2, 128], strides = [1, 1]} : vector<2x256xf32> to vector<2x128xf32>
    %20 = vector.extract_strided_slice %18 {offsets = [0, 0], sizes = [2, 128], strides = [1, 1]} : vector<2x256xf32> to vector<2x128xf32>
    %21 = vector.extract_strided_slice %19 {offsets = [0, 0], sizes = [2, 32], strides = [1, 1]} : vector<2x128xf32> to vector<2x32xf32>
    %22 = vector.extract_strided_slice %19 {offsets = [0, 32], sizes = [2, 32], strides = [1, 1]} : vector<2x128xf32> to vector<2x32xf32>
    %23 = vector.extract_strided_slice %20 {offsets = [0, 64], sizes = [2, 32], strides = [1, 1]} : vector<2x128xf32> to vector<2x32xf32>
    %24 = vector.extract_strided_slice %19 {offsets = [0, 96], sizes = [2, 32], strides = [1, 1]} : vector<2x128xf32> to vector<2x32xf32>
    %25 = arith.mulf %22, %8 : vector<2x32xf32>
    %26 = arith.mulf %21, %23 : vector<2x32xf32>
    %27 = arith.addf %25, %26 : vector<2x32xf32>
    %28 = math.tanh %27 : vector<2x32xf32>
    %29 = arith.mulf %24, %28 : vector<2x32xf32>
    %30 = vector.extract_strided_slice %17 {offsets = [0, 128], sizes = [2, 128], strides = [1, 1]} : vector<2x256xf32> to vector<2x128xf32>
    %31 = vector.extract_strided_slice %18 {offsets = [0, 128], sizes = [2, 128], strides = [1, 1]} : vector<2x256xf32> to vector<2x128xf32>
    %32 = vector.extract_strided_slice %30 {offsets = [0, 0], sizes = [2, 32], strides = [1, 1]} : vector<2x128xf32> to vector<2x32xf32>
    %33 = vector.extract_strided_slice %30 {offsets = [0, 32], sizes = [2, 32], strides = [1, 1]} : vector<2x128xf32> to vector<2x32xf32>
    %34 = vector.extract_strided_slice %31 {offsets = [0, 64], sizes = [2, 32], strides = [1, 1]} : vector<2x128xf32> to vector<2x32xf32>
    %35 = vector.extract_strided_slice %30 {offsets = [0, 96], sizes = [2, 32], strides = [1, 1]} : vector<2x128xf32> to vector<2x32xf32>
    %36 = arith.mulf %33, %9 : vector<2x32xf32>
    %37 = arith.mulf %32, %34 : vector<2x32xf32>
    %38 = arith.addf %36, %37 : vector<2x32xf32>
    %39 = math.tanh %38 : vector<2x32xf32>
    %40 = arith.mulf %35, %39 : vector<2x32xf32>
    %c0_6 = arith.constant 0 : index
    %c0_7 = arith.constant 0 : index
    %c0_8 = arith.constant 0 : index
    %41 = vector.load %arg3[%c0_6, %c0_7, %c0_8] : memref<8x2x64xf32, #tpu.memory_space<vmem>>, vector<1x2x32xf32>
    %42 = vector.shape_cast %41 : vector<1x2x32xf32> to vector<2x32xf32>
    %43 = vector.shape_cast %29 : vector<2x32xf32> to vector<1x2x32xf32>
    tpu.vector_store %arg3[%c0_6, %c0_7, %c0_8], %43 {strides = array<i32>} : memref<8x2x64xf32, #tpu.memory_space<vmem>>, vector<1x2x32xf32>,
    %c7 = arith.constant 7 : index
    %c0_9 = arith.constant 0 : index
    %c32 = arith.constant 32 : index
    %44 = vector.load %arg3[%c7, %c0_9, %c32] : memref<8x2x64xf32, #tpu.memory_space<vmem>>, vector<1x2x32xf32>
    %45 = vector.shape_cast %44 : vector<1x2x32xf32> to vector<2x32xf32>
    %46 = vector.shape_cast %40 : vector<2x32xf32> to vector<1x2x32xf32>
    tpu.vector_store %arg3[%c7, %c0_9, %c32], %46 {strides = array<i32>} : memref<8x2x64xf32, #tpu.memory_space<vmem>>, vector<1x2x32xf32>,
    %47 = vector.extract_strided_slice %7 {offsets = [2, 0], sizes = [2, 128], strides = [1, 1]} : vector<16x256xf32> to vector<2x128xf32>
    %48 = vector.extract_strided_slice %7 {offsets = [12, 128], sizes = [2, 128], strides = [1, 1]} : vector<16x256xf32> to vector<2x128xf32>
    %49 = tpu.concatenate %47, %48 in 1 : vector<2x128xf32>, vector<2x128xf32> -> vector<2x256xf32>
    %50 = tpu.concatenate %29, %40 in 1 : vector<2x32xf32>, vector<2x32xf32> -> vector<2x64xf32>
    %c0_10 = arith.constant 0 : index
    %c0_11 = arith.constant 0 : index
    %51 = vector.load %arg2[%c0_10, %c0_11] : memref<64x256xf32, #tpu.memory_space<vmem>>, vector<64x256xf32>
    %cst_12 = arith.constant dense<0.000000e+00> : vector<2x256xf32>
    %52 = tpu.matmul %50, %51, %cst_12 {dimension_numbers = #tpu.dot_dimension_numbers<[1], [0], [0], [1], [0, 0, 1, 1], [], []>} : vector<2x64xf32>, vector<64x256xf32>, vector<2x256xf32> -> vector<2x256xf32>
    %53 = arith.addf %49, %52 : vector<2x256xf32>
    %54 = arith.negf %53 : vector<2x256xf32>
    %55 = math.exp %54 : vector<2x256xf32>
    %cst_13 = arith.constant 1.000000e+00 : f32
    %56 = vector.broadcast %cst_13 : f32 to vector<2x256xf32>
    %57 = arith.addf %56, %55 : vector<2x256xf32>
    %58 = arith.divf %56, %57 : vector<2x256xf32>
    %59 = math.tanh %53 : vector<2x256xf32>
    %60 = vector.extract_strided_slice %58 {offsets = [0, 0], sizes = [2, 128], strides = [1, 1]} : vector<2x256xf32> to vector<2x128xf32>
    %61 = vector.extract_strided_slice %59 {offsets = [0, 0], sizes = [2, 128], strides = [1, 1]} : vector<2x256xf32> to vector<2x128xf32>
    %62 = vector.extract_strided_slice %60 {offsets = [0, 0], sizes = [2, 32], strides = [1, 1]} : vector<2x128xf32> to vector<2x32xf32>
    %63 = vector.extract_strided_slice %60 {offsets = [0, 32], sizes = [2, 32], strides = [1, 1]} : vector<2x128xf32> to vector<2x32xf32>
    %64 = vector.extract_strided_slice %61 {offsets = [0, 64], sizes = [2, 32], strides = [1, 1]} : vector<2x128xf32> to vector<2x32xf32>
    %65 = vector.extract_strided_slice %60 {offsets = [0, 96], sizes = [2, 32], strides = [1, 1]} : vector<2x128xf32> to vector<2x32xf32>
    %66 = arith.mulf %63, %27 : vector<2x32xf32>
    %67 = arith.mulf %62, %64 : vector<2x32xf32>
    %68 = arith.addf %66, %67 : vector<2x32xf32>
    %69 = math.tanh %68 : vector<2x32xf32>
    %70 = arith.mulf %65, %69 : vector<2x32xf32>
    %71 = vector.extract_strided_slice %58 {offsets = [0, 128], sizes = [2, 128], strides = [1, 1]} : vector<2x256xf32> to vector<2x128xf32>
    %72 = vector.extract_strided_slice %59 {offsets = [0, 128], sizes = [2, 128], strides = [1, 1]} : vector<2x256xf32> to vector<2x128xf32>
    %73 = vector.extract_strided_slice %71 {offsets = [0, 0], sizes = [2, 32], strides = [1, 1]} : vector<2x128xf32> to vector<2x32xf32>
    %74 = vector.extract_strided_slice %71 {offsets = [0, 32], sizes = [2, 32], strides = [1, 1]} : vector<2x128xf32> to vector<2x32xf32>
    %75 = vector.extract_strided_slice %72 {offsets = [0, 64], sizes = [2, 32], strides = [1, 1]} : vector<2x128xf32> to vector<2x32xf32>
    %76 = vector.extract_strided_slice %71 {offsets = [0, 96], sizes = [2, 32], strides = [1, 1]} : vector<2x128xf32> to vector<2x32xf32>
    %77 = arith.mulf %74, %38 : vector<2x32xf32>
    %78 = arith.mulf %73, %75 : vector<2x32xf32>
    %79 = arith.addf %77, %78 : vector<2x32xf32>
    %80 = math.tanh %79 : vector<2x32xf32>
    %81 = arith.mulf %76, %80 : vector<2x32xf32>
    %c1 = arith.constant 1 : index
    %c0_14 = arith.constant 0 : index
    %c0_15 = arith.constant 0 : index
    %82 = vector.load %arg3[%c1, %c0_14, %c0_15] : memref<8x2x64xf32, #tpu.memory_space<vmem>>, vector<1x2x32xf32>
    %83 = vector.shape_cast %82 : vector<1x2x32xf32> to vector<2x32xf32>
    %84 = vector.shape_cast %70 : vector<2x32xf32> to vector<1x2x32xf32>
    tpu.vector_store %arg3[%c1, %c0_14, %c0_15], %84 {strides = array<i32>} : memref<8x2x64xf32, #tpu.memory_space<vmem>>, vector<1x2x32xf32>,
    %c6 = arith.constant 6 : index
    %c0_16 = arith.constant 0 : index
    %c32_17 = arith.constant 32 : index
    %85 = vector.load %arg3[%c6, %c0_16, %c32_17] : memref<8x2x64xf32, #tpu.memory_space<vmem>>, vector<1x2x32xf32>
    %86 = vector.shape_cast %85 : vector<1x2x32xf32> to vector<2x32xf32>
    %87 = vector.shape_cast %81 : vector<2x32xf32> to vector<1x2x32xf32>
    tpu.vector_store %arg3[%c6, %c0_16, %c32_17], %87 {strides = array<i32>} : memref<8x2x64xf32, #tpu.memory_space<vmem>>, vector<1x2x32xf32>,
    %88 = vector.extract_strided_slice %7 {offsets = [4, 0], sizes = [2, 128], strides = [1, 1]} : vector<16x256xf32> to vector<2x128xf32>
    %89 = vector.extract_strided_slice %7 {offsets = [10, 128], sizes = [2, 128], strides = [1, 1]} : vector<16x256xf32> to vector<2x128xf32>
    %90 = tpu.concatenate %88, %89 in 1 : vector<2x128xf32>, vector<2x128xf32> -> vector<2x256xf32>
    %91 = tpu.concatenate %70, %81 in 1 : vector<2x32xf32>, vector<2x32xf32> -> vector<2x64xf32>
    %c0_18 = arith.constant 0 : index
    %c0_19 = arith.constant 0 : index
    %92 = vector.load %arg2[%c0_18, %c0_19] : memref<64x256xf32, #tpu.memory_space<vmem>>, vector<64x256xf32>
    %cst_20 = arith.constant dense<0.000000e+00> : vector<2x256xf32>
    %93 = tpu.matmul %91, %92, %cst_20 {dimension_numbers = #tpu.dot_dimension_numbers<[1], [0], [0], [1], [0, 0, 1, 1], [], []>} : vector<2x64xf32>, vector<64x256xf32>, vector<2x256xf32> -> vector<2x256xf32>
    %94 = arith.addf %90, %93 : vector<2x256xf32>
    %95 = arith.negf %94 : vector<2x256xf32>
    %96 = math.exp %95 : vector<2x256xf32>
    %cst_21 = arith.constant 1.000000e+00 : f32
    %97 = vector.broadcast %cst_21 : f32 to vector<2x256xf32>
    %98 = arith.addf %97, %96 : vector<2x256xf32>
    %99 = arith.divf %97, %98 : vector<2x256xf32>
    %100 = math.tanh %94 : vector<2x256xf32>
    %101 = vector.extract_strided_slice %99 {offsets = [0, 0], sizes = [2, 128], strides = [1, 1]} : vector<2x256xf32> to vector<2x128xf32>
    %102 = vector.extract_strided_slice %100 {offsets = [0, 0], sizes = [2, 128], strides = [1, 1]} : vector<2x256xf32> to vector<2x128xf32>
    %103 = vector.extract_strided_slice %101 {offsets = [0, 0], sizes = [2, 32], strides = [1, 1]} : vector<2x128xf32> to vector<2x32xf32>
    %104 = vector.extract_strided_slice %101 {offsets = [0, 32], sizes = [2, 32], strides = [1, 1]} : vector<2x128xf32> to vector<2x32xf32>
    %105 = vector.extract_strided_slice %102 {offsets = [0, 64], sizes = [2, 32], strides = [1, 1]} : vector<2x128xf32> to vector<2x32xf32>
    %106 = vector.extract_strided_slice %101 {offsets = [0, 96], sizes = [2, 32], strides = [1, 1]} : vector<2x128xf32> to vector<2x32xf32>
    %107 = arith.mulf %104, %68 : vector<2x32xf32>
    %108 = arith.mulf %103, %105 : vector<2x32xf32>
    %109 = arith.addf %107, %108 : vector<2x32xf32>
    %110 = math.tanh %109 : vector<2x32xf32>
    %111 = arith.mulf %106, %110 : vector<2x32xf32>
    %112 = vector.extract_strided_slice %99 {offsets = [0, 128], sizes = [2, 128], strides = [1, 1]} : vector<2x256xf32> to vector<2x128xf32>
    %113 = vector.extract_strided_slice %100 {offsets = [0, 128], sizes = [2, 128], strides = [1, 1]} : vector<2x256xf32> to vector<2x128xf32>
    %114 = vector.extract_strided_slice %112 {offsets = [0, 0], sizes = [2, 32], strides = [1, 1]} : vector<2x128xf32> to vector<2x32xf32>
    %115 = vector.extract_strided_slice %112 {offsets = [0, 32], sizes = [2, 32], strides = [1, 1]} : vector<2x128xf32> to vector<2x32xf32>
    %116 = vector.extract_strided_slice %113 {offsets = [0, 64], sizes = [2, 32], strides = [1, 1]} : vector<2x128xf32> to vector<2x32xf32>
    %117 = vector.extract_strided_slice %112 {offsets = [0, 96], sizes = [2, 32], strides = [1, 1]} : vector<2x128xf32> to vector<2x32xf32>
    %118 = arith.mulf %115, %79 : vector<2x32xf32>
    %119 = arith.mulf %114, %116 : vector<2x32xf32>
    %120 = arith.addf %118, %119 : vector<2x32xf32>
    %121 = math.tanh %120 : vector<2x32xf32>
    %122 = arith.mulf %117, %121 : vector<2x32xf32>
    %c2 = arith.constant 2 : index
    %c0_22 = arith.constant 0 : index
    %c0_23 = arith.constant 0 : index
    %123 = vector.load %arg3[%c2, %c0_22, %c0_23] : memref<8x2x64xf32, #tpu.memory_space<vmem>>, vector<1x2x32xf32>
    %124 = vector.shape_cast %123 : vector<1x2x32xf32> to vector<2x32xf32>
    %125 = vector.shape_cast %111 : vector<2x32xf32> to vector<1x2x32xf32>
    tpu.vector_store %arg3[%c2, %c0_22, %c0_23], %125 {strides = array<i32>} : memref<8x2x64xf32, #tpu.memory_space<vmem>>, vector<1x2x32xf32>,
    %c5 = arith.constant 5 : index
    %c0_24 = arith.constant 0 : index
    %c32_25 = arith.constant 32 : index
    %126 = vector.load %arg3[%c5, %c0_24, %c32_25] : memref<8x2x64xf32, #tpu.memory_space<vmem>>, vector<1x2x32xf32>
    %127 = vector.shape_cast %126 : vector<1x2x32xf32> to vector<2x32xf32>
    %128 = vector.shape_cast %122 : vector<2x32xf32> to vector<1x2x32xf32>
    tpu.vector_store %arg3[%c5, %c0_24, %c32_25], %128 {strides = array<i32>} : memref<8x2x64xf32, #tpu.memory_space<vmem>>, vector<1x2x32xf32>,
    %129 = vector.extract_strided_slice %7 {offsets = [6, 0], sizes = [2, 128], strides = [1, 1]} : vector<16x256xf32> to vector<2x128xf32>
    %130 = vector.extract_strided_slice %7 {offsets = [8, 128], sizes = [2, 128], strides = [1, 1]} : vector<16x256xf32> to vector<2x128xf32>
    %131 = tpu.concatenate %129, %130 in 1 : vector<2x128xf32>, vector<2x128xf32> -> vector<2x256xf32>
    %132 = tpu.concatenate %111, %122 in 1 : vector<2x32xf32>, vector<2x32xf32> -> vector<2x64xf32>
    %c0_26 = arith.constant 0 : index
    %c0_27 = arith.constant 0 : index
    %133 = vector.load %arg2[%c0_26, %c0_27] : memref<64x256xf32, #tpu.memory_space<vmem>>, vector<64x256xf32>
    %cst_28 = arith.constant dense<0.000000e+00> : vector<2x256xf32>
    %134 = tpu.matmul %132, %133, %cst_28 {dimension_numbers = #tpu.dot_dimension_numbers<[1], [0], [0], [1], [0, 0, 1, 1], [], []>} : vector<2x64xf32>, vector<64x256xf32>, vector<2x256xf32> -> vector<2x256xf32>
    %135 = arith.addf %131, %134 : vector<2x256xf32>
    %136 = arith.negf %135 : vector<2x256xf32>
    %137 = math.exp %136 : vector<2x256xf32>
    %cst_29 = arith.constant 1.000000e+00 : f32
    %138 = vector.broadcast %cst_29 : f32 to vector<2x256xf32>
    %139 = arith.addf %138, %137 : vector<2x256xf32>
    %140 = arith.divf %138, %139 : vector<2x256xf32>
    %141 = math.tanh %135 : vector<2x256xf32>
    %142 = vector.extract_strided_slice %140 {offsets = [0, 0], sizes = [2, 128], strides = [1, 1]} : vector<2x256xf32> to vector<2x128xf32>
    %143 = vector.extract_strided_slice %141 {offsets = [0, 0], sizes = [2, 128], strides = [1, 1]} : vector<2x256xf32> to vector<2x128xf32>
    %144 = vector.extract_strided_slice %142 {offsets = [0, 0], sizes = [2, 32], strides = [1, 1]} : vector<2x128xf32> to vector<2x32xf32>
    %145 = vector.extract_strided_slice %142 {offsets = [0, 32], sizes = [2, 32], strides = [1, 1]} : vector<2x128xf32> to vector<2x32xf32>
    %146 = vector.extract_strided_slice %143 {offsets = [0, 64], sizes = [2, 32], strides = [1, 1]} : vector<2x128xf32> to vector<2x32xf32>
    %147 = vector.extract_strided_slice %142 {offsets = [0, 96], sizes = [2, 32], strides = [1, 1]} : vector<2x128xf32> to vector<2x32xf32>
    %148 = arith.mulf %145, %109 : vector<2x32xf32>
    %149 = arith.mulf %144, %146 : vector<2x32xf32>
    %150 = arith.addf %148, %149 : vector<2x32xf32>
    %151 = math.tanh %150 : vector<2x32xf32>
    %152 = arith.mulf %147, %151 : vector<2x32xf32>
    %153 = vector.extract_strided_slice %140 {offsets = [0, 128], sizes = [2, 128], strides = [1, 1]} : vector<2x256xf32> to vector<2x128xf32>
    %154 = vector.extract_strided_slice %141 {offsets = [0, 128], sizes = [2, 128], strides = [1, 1]} : vector<2x256xf32> to vector<2x128xf32>
    %155 = vector.extract_strided_slice %153 {offsets = [0, 0], sizes = [2, 32], strides = [1, 1]} : vector<2x128xf32> to vector<2x32xf32>
    %156 = vector.extract_strided_slice %153 {offsets = [0, 32], sizes = [2, 32], strides = [1, 1]} : vector<2x128xf32> to vector<2x32xf32>
    %157 = vector.extract_strided_slice %154 {offsets = [0, 64], sizes = [2, 32], strides = [1, 1]} : vector<2x128xf32> to vector<2x32xf32>
    %158 = vector.extract_strided_slice %153 {offsets = [0, 96], sizes = [2, 32], strides = [1, 1]} : vector<2x128xf32> to vector<2x32xf32>
    %159 = arith.mulf %156, %120 : vector<2x32xf32>
    %160 = arith.mulf %155, %157 : vector<2x32xf32>
    %161 = arith.addf %159, %160 : vector<2x32xf32>
    %162 = math.tanh %161 : vector<2x32xf32>
    %163 = arith.mulf %158, %162 : vector<2x32xf32>
    %c3 = arith.constant 3 : index
    %c0_30 = arith.constant 0 : index
    %c0_31 = arith.constant 0 : index
    %164 = vector.load %arg3[%c3, %c0_30, %c0_31] : memref<8x2x64xf32, #tpu.memory_space<vmem>>, vector<1x2x32xf32>
    %165 = vector.shape_cast %164 : vector<1x2x32xf32> to vector<2x32xf32>
    %166 = vector.shape_cast %152 : vector<2x32xf32> to vector<1x2x32xf32>
    tpu.vector_store %arg3[%c3, %c0_30, %c0_31], %166 {strides = array<i32>} : memref<8x2x64xf32, #tpu.memory_space<vmem>>, vector<1x2x32xf32>,
    %c4 = arith.constant 4 : index
    %c0_32 = arith.constant 0 : index
    %c32_33 = arith.constant 32 : index
    %167 = vector.load %arg3[%c4, %c0_32, %c32_33] : memref<8x2x64xf32, #tpu.memory_space<vmem>>, vector<1x2x32xf32>
    %168 = vector.shape_cast %167 : vector<1x2x32xf32> to vector<2x32xf32>
    %169 = vector.shape_cast %163 : vector<2x32xf32> to vector<1x2x32xf32>
    tpu.vector_store %arg3[%c4, %c0_32, %c32_33], %169 {strides = array<i32>} : memref<8x2x64xf32, #tpu.memory_space<vmem>>, vector<1x2x32xf32>,
    %170 = vector.extract_strided_slice %7 {offsets = [8, 0], sizes = [2, 128], strides = [1, 1]} : vector<16x256xf32> to vector<2x128xf32>
    %171 = vector.extract_strided_slice %7 {offsets = [6, 128], sizes = [2, 128], strides = [1, 1]} : vector<16x256xf32> to vector<2x128xf32>
    %172 = tpu.concatenate %170, %171 in 1 : vector<2x128xf32>, vector<2x128xf32> -> vector<2x256xf32>
    %173 = tpu.concatenate %152, %163 in 1 : vector<2x32xf32>, vector<2x32xf32> -> vector<2x64xf32>
    %c0_34 = arith.constant 0 : index
    %c0_35 = arith.constant 0 : index
    %174 = vector.load %arg2[%c0_34, %c0_35] : memref<64x256xf32, #tpu.memory_space<vmem>>, vector<64x256xf32>
    %cst_36 = arith.constant dense<0.000000e+00> : vector<2x256xf32>
    %175 = tpu.matmul %173, %174, %cst_36 {dimension_numbers = #tpu.dot_dimension_numbers<[1], [0], [0], [1], [0, 0, 1, 1], [], []>} : vector<2x64xf32>, vector<64x256xf32>, vector<2x256xf32> -> vector<2x256xf32>
    %176 = arith.addf %172, %175 : vector<2x256xf32>
    %177 = arith.negf %176 : vector<2x256xf32>
    %178 = math.exp %177 : vector<2x256xf32>
    %cst_37 = arith.constant 1.000000e+00 : f32
    %179 = vector.broadcast %cst_37 : f32 to vector<2x256xf32>
    %180 = arith.addf %179, %178 : vector<2x256xf32>
    %181 = arith.divf %179, %180 : vector<2x256xf32>
    %182 = math.tanh %176 : vector<2x256xf32>
    %183 = vector.extract_strided_slice %181 {offsets = [0, 0], sizes = [2, 128], strides = [1, 1]} : vector<2x256xf32> to vector<2x128xf32>
    %184 = vector.extract_strided_slice %182 {offsets = [0, 0], sizes = [2, 128], strides = [1, 1]} : vector<2x256xf32> to vector<2x128xf32>
    %185 = vector.extract_strided_slice %183 {offsets = [0, 0], sizes = [2, 32], strides = [1, 1]} : vector<2x128xf32> to vector<2x32xf32>
    %186 = vector.extract_strided_slice %183 {offsets = [0, 32], sizes = [2, 32], strides = [1, 1]} : vector<2x128xf32> to vector<2x32xf32>
    %187 = vector.extract_strided_slice %184 {offsets = [0, 64], sizes = [2, 32], strides = [1, 1]} : vector<2x128xf32> to vector<2x32xf32>
    %188 = vector.extract_strided_slice %183 {offsets = [0, 96], sizes = [2, 32], strides = [1, 1]} : vector<2x128xf32> to vector<2x32xf32>
    %189 = arith.mulf %186, %150 : vector<2x32xf32>
    %190 = arith.mulf %185, %187 : vector<2x32xf32>
    %191 = arith.addf %189, %190 : vector<2x32xf32>
    %192 = math.tanh %191 : vector<2x32xf32>
    %193 = arith.mulf %188, %192 : vector<2x32xf32>
    %194 = vector.extract_strided_slice %181 {offsets = [0, 128], sizes = [2, 128], strides = [1, 1]} : vector<2x256xf32> to vector<2x128xf32>
    %195 = vector.extract_strided_slice %182 {offsets = [0, 128], sizes = [2, 128], strides = [1, 1]} : vector<2x256xf32> to vector<2x128xf32>
    %196 = vector.extract_strided_slice %194 {offsets = [0, 0], sizes = [2, 32], strides = [1, 1]} : vector<2x128xf32> to vector<2x32xf32>
    %197 = vector.extract_strided_slice %194 {offsets = [0, 32], sizes = [2, 32], strides = [1, 1]} : vector<2x128xf32> to vector<2x32xf32>
    %198 = vector.extract_strided_slice %195 {offsets = [0, 64], sizes = [2, 32], strides = [1, 1]} : vector<2x128xf32> to vector<2x32xf32>
    %199 = vector.extract_strided_slice %194 {offsets = [0, 96], sizes = [2, 32], strides = [1, 1]} : vector<2x128xf32> to vector<2x32xf32>
    %200 = arith.mulf %197, %161 : vector<2x32xf32>
    %201 = arith.mulf %196, %198 : vector<2x32xf32>
    %202 = arith.addf %200, %201 : vector<2x32xf32>
    %203 = math.tanh %202 : vector<2x32xf32>
    %204 = arith.mulf %199, %203 : vector<2x32xf32>
    %c4_38 = arith.constant 4 : index
    %c0_39 = arith.constant 0 : index
    %c0_40 = arith.constant 0 : index
    %205 = vector.load %arg3[%c4_38, %c0_39, %c0_40] : memref<8x2x64xf32, #tpu.memory_space<vmem>>, vector<1x2x32xf32>
    %206 = vector.shape_cast %205 : vector<1x2x32xf32> to vector<2x32xf32>
    %207 = vector.shape_cast %193 : vector<2x32xf32> to vector<1x2x32xf32>
    tpu.vector_store %arg3[%c4_38, %c0_39, %c0_40], %207 {strides = array<i32>} : memref<8x2x64xf32, #tpu.memory_space<vmem>>, vector<1x2x32xf32>,
    %c3_41 = arith.constant 3 : index
    %c0_42 = arith.constant 0 : index
    %c32_43 = arith.constant 32 : index
    %208 = vector.load %arg3[%c3_41, %c0_42, %c32_43] : memref<8x2x64xf32, #tpu.memory_space<vmem>>, vector<1x2x32xf32>
    %209 = vector.shape_cast %208 : vector<1x2x32xf32> to vector<2x32xf32>
    %210 = vector.shape_cast %204 : vector<2x32xf32> to vector<1x2x32xf32>
    tpu.vector_store %arg3[%c3_41, %c0_42, %c32_43], %210 {strides = array<i32>} : memref<8x2x64xf32, #tpu.memory_space<vmem>>, vector<1x2x32xf32>,
    %211 = vector.extract_strided_slice %7 {offsets = [10, 0], sizes = [2, 128], strides = [1, 1]} : vector<16x256xf32> to vector<2x128xf32>
    %212 = vector.extract_strided_slice %7 {offsets = [4, 128], sizes = [2, 128], strides = [1, 1]} : vector<16x256xf32> to vector<2x128xf32>
    %213 = tpu.concatenate %211, %212 in 1 : vector<2x128xf32>, vector<2x128xf32> -> vector<2x256xf32>
    %214 = tpu.concatenate %193, %204 in 1 : vector<2x32xf32>, vector<2x32xf32> -> vector<2x64xf32>
    %c0_44 = arith.constant 0 : index
    %c0_45 = arith.constant 0 : index
    %215 = vector.load %arg2[%c0_44, %c0_45] : memref<64x256xf32, #tpu.memory_space<vmem>>, vector<64x256xf32>
    %cst_46 = arith.constant dense<0.000000e+00> : vector<2x256xf32>
    %216 = tpu.matmul %214, %215, %cst_46 {dimension_numbers = #tpu.dot_dimension_numbers<[1], [0], [0], [1], [0, 0, 1, 1], [], []>} : vector<2x64xf32>, vector<64x256xf32>, vector<2x256xf32> -> vector<2x256xf32>
    %217 = arith.addf %213, %216 : vector<2x256xf32>
    %218 = arith.negf %217 : vector<2x256xf32>
    %219 = math.exp %218 : vector<2x256xf32>
    %cst_47 = arith.constant 1.000000e+00 : f32
    %220 = vector.broadcast %cst_47 : f32 to vector<2x256xf32>
    %221 = arith.addf %220, %219 : vector<2x256xf32>
    %222 = arith.divf %220, %221 : vector<2x256xf32>
    %223 = math.tanh %217 : vector<2x256xf32>
    %224 = vector.extract_strided_slice %222 {offsets = [0, 0], sizes = [2, 128], strides = [1, 1]} : vector<2x256xf32> to vector<2x128xf32>
    %225 = vector.extract_strided_slice %223 {offsets = [0, 0], sizes = [2, 128], strides = [1, 1]} : vector<2x256xf32> to vector<2x128xf32>
    %226 = vector.extract_strided_slice %224 {offsets = [0, 0], sizes = [2, 32], strides = [1, 1]} : vector<2x128xf32> to vector<2x32xf32>
    %227 = vector.extract_strided_slice %224 {offsets = [0, 32], sizes = [2, 32], strides = [1, 1]} : vector<2x128xf32> to vector<2x32xf32>
    %228 = vector.extract_strided_slice %225 {offsets = [0, 64], sizes = [2, 32], strides = [1, 1]} : vector<2x128xf32> to vector<2x32xf32>
    %229 = vector.extract_strided_slice %224 {offsets = [0, 96], sizes = [2, 32], strides = [1, 1]} : vector<2x128xf32> to vector<2x32xf32>
    %230 = arith.mulf %227, %191 : vector<2x32xf32>
    %231 = arith.mulf %226, %228 : vector<2x32xf32>
    %232 = arith.addf %230, %231 : vector<2x32xf32>
    %233 = math.tanh %232 : vector<2x32xf32>
    %234 = arith.mulf %229, %233 : vector<2x32xf32>
    %235 = vector.extract_strided_slice %222 {offsets = [0, 128], sizes = [2, 128], strides = [1, 1]} : vector<2x256xf32> to vector<2x128xf32>
    %236 = vector.extract_strided_slice %223 {offsets = [0, 128], sizes = [2, 128], strides = [1, 1]} : vector<2x256xf32> to vector<2x128xf32>
    %237 = vector.extract_strided_slice %235 {offsets = [0, 0], sizes = [2, 32], strides = [1, 1]} : vector<2x128xf32> to vector<2x32xf32>
    %238 = vector.extract_strided_slice %235 {offsets = [0, 32], sizes = [2, 32], strides = [1, 1]} : vector<2x128xf32> to vector<2x32xf32>
    %239 = vector.extract_strided_slice %236 {offsets = [0, 64], sizes = [2, 32], strides = [1, 1]} : vector<2x128xf32> to vector<2x32xf32>
    %240 = vector.extract_strided_slice %235 {offsets = [0, 96], sizes = [2, 32], strides = [1, 1]} : vector<2x128xf32> to vector<2x32xf32>
    %241 = arith.mulf %238, %202 : vector<2x32xf32>
    %242 = arith.mulf %237, %239 : vector<2x32xf32>
    %243 = arith.addf %241, %242 : vector<2x32xf32>
    %244 = math.tanh %243 : vector<2x32xf32>
    %245 = arith.mulf %240, %244 : vector<2x32xf32>
    %c5_48 = arith.constant 5 : index
    %c0_49 = arith.constant 0 : index
    %c0_50 = arith.constant 0 : index
    %246 = vector.load %arg3[%c5_48, %c0_49, %c0_50] : memref<8x2x64xf32, #tpu.memory_space<vmem>>, vector<1x2x32xf32>
    %247 = vector.shape_cast %246 : vector<1x2x32xf32> to vector<2x32xf32>
    %248 = vector.shape_cast %234 : vector<2x32xf32> to vector<1x2x32xf32>
    tpu.vector_store %arg3[%c5_48, %c0_49, %c0_50], %248 {strides = array<i32>} : memref<8x2x64xf32, #tpu.memory_space<vmem>>, vector<1x2x32xf32>,
    %c2_51 = arith.constant 2 : index
    %c0_52 = arith.constant 0 : index
    %c32_53 = arith.constant 32 : index
    %249 = vector.load %arg3[%c2_51, %c0_52, %c32_53] : memref<8x2x64xf32, #tpu.memory_space<vmem>>, vector<1x2x32xf32>
    %250 = vector.shape_cast %249 : vector<1x2x32xf32> to vector<2x32xf32>
    %251 = vector.shape_cast %245 : vector<2x32xf32> to vector<1x2x32xf32>
    tpu.vector_store %arg3[%c2_51, %c0_52, %c32_53], %251 {strides = array<i32>} : memref<8x2x64xf32, #tpu.memory_space<vmem>>, vector<1x2x32xf32>,
    %252 = vector.extract_strided_slice %7 {offsets = [12, 0], sizes = [2, 128], strides = [1, 1]} : vector<16x256xf32> to vector<2x128xf32>
    %253 = vector.extract_strided_slice %7 {offsets = [2, 128], sizes = [2, 128], strides = [1, 1]} : vector<16x256xf32> to vector<2x128xf32>
    %254 = tpu.concatenate %252, %253 in 1 : vector<2x128xf32>, vector<2x128xf32> -> vector<2x256xf32>
    %255 = tpu.concatenate %234, %245 in 1 : vector<2x32xf32>, vector<2x32xf32> -> vector<2x64xf32>
    %c0_54 = arith.constant 0 : index
    %c0_55 = arith.constant 0 : index
    %256 = vector.load %arg2[%c0_54, %c0_55] : memref<64x256xf32, #tpu.memory_space<vmem>>, vector<64x256xf32>
    %cst_56 = arith.constant dense<0.000000e+00> : vector<2x256xf32>
    %257 = tpu.matmul %255, %256, %cst_56 {dimension_numbers = #tpu.dot_dimension_numbers<[1], [0], [0], [1], [0, 0, 1, 1], [], []>} : vector<2x64xf32>, vector<64x256xf32>, vector<2x256xf32> -> vector<2x256xf32>
    %258 = arith.addf %254, %257 : vector<2x256xf32>
    %259 = arith.negf %258 : vector<2x256xf32>
    %260 = math.exp %259 : vector<2x256xf32>
    %cst_57 = arith.constant 1.000000e+00 : f32
    %261 = vector.broadcast %cst_57 : f32 to vector<2x256xf32>
    %262 = arith.addf %261, %260 : vector<2x256xf32>
    %263 = arith.divf %261, %262 : vector<2x256xf32>
    %264 = math.tanh %258 : vector<2x256xf32>
    %265 = vector.extract_strided_slice %263 {offsets = [0, 0], sizes = [2, 128], strides = [1, 1]} : vector<2x256xf32> to vector<2x128xf32>
    %266 = vector.extract_strided_slice %264 {offsets = [0, 0], sizes = [2, 128], strides = [1, 1]} : vector<2x256xf32> to vector<2x128xf32>
    %267 = vector.extract_strided_slice %265 {offsets = [0, 0], sizes = [2, 32], strides = [1, 1]} : vector<2x128xf32> to vector<2x32xf32>
    %268 = vector.extract_strided_slice %265 {offsets = [0, 32], sizes = [2, 32], strides = [1, 1]} : vector<2x128xf32> to vector<2x32xf32>
    %269 = vector.extract_strided_slice %266 {offsets = [0, 64], sizes = [2, 32], strides = [1, 1]} : vector<2x128xf32> to vector<2x32xf32>
    %270 = vector.extract_strided_slice %265 {offsets = [0, 96], sizes = [2, 32], strides = [1, 1]} : vector<2x128xf32> to vector<2x32xf32>
    %271 = arith.mulf %268, %232 : vector<2x32xf32>
    %272 = arith.mulf %267, %269 : vector<2x32xf32>
    %273 = arith.addf %271, %272 : vector<2x32xf32>
    %274 = math.tanh %273 : vector<2x32xf32>
    %275 = arith.mulf %270, %274 : vector<2x32xf32>
    %276 = vector.extract_strided_slice %263 {offsets = [0, 128], sizes = [2, 128], strides = [1, 1]} : vector<2x256xf32> to vector<2x128xf32>
    %277 = vector.extract_strided_slice %264 {offsets = [0, 128], sizes = [2, 128], strides = [1, 1]} : vector<2x256xf32> to vector<2x128xf32>
    %278 = vector.extract_strided_slice %276 {offsets = [0, 0], sizes = [2, 32], strides = [1, 1]} : vector<2x128xf32> to vector<2x32xf32>
    %279 = vector.extract_strided_slice %276 {offsets = [0, 32], sizes = [2, 32], strides = [1, 1]} : vector<2x128xf32> to vector<2x32xf32>
    %280 = vector.extract_strided_slice %277 {offsets = [0, 64], sizes = [2, 32], strides = [1, 1]} : vector<2x128xf32> to vector<2x32xf32>
    %281 = vector.extract_strided_slice %276 {offsets = [0, 96], sizes = [2, 32], strides = [1, 1]} : vector<2x128xf32> to vector<2x32xf32>
    %282 = arith.mulf %279, %243 : vector<2x32xf32>
    %283 = arith.mulf %278, %280 : vector<2x32xf32>
    %284 = arith.addf %282, %283 : vector<2x32xf32>
    %285 = math.tanh %284 : vector<2x32xf32>
    %286 = arith.mulf %281, %285 : vector<2x32xf32>
    %c6_58 = arith.constant 6 : index
    %c0_59 = arith.constant 0 : index
    %c0_60 = arith.constant 0 : index
    %287 = vector.load %arg3[%c6_58, %c0_59, %c0_60] : memref<8x2x64xf32, #tpu.memory_space<vmem>>, vector<1x2x32xf32>
    %288 = vector.shape_cast %287 : vector<1x2x32xf32> to vector<2x32xf32>
    %289 = vector.shape_cast %275 : vector<2x32xf32> to vector<1x2x32xf32>
    tpu.vector_store %arg3[%c6_58, %c0_59, %c0_60], %289 {strides = array<i32>} : memref<8x2x64xf32, #tpu.memory_space<vmem>>, vector<1x2x32xf32>,
    %c1_61 = arith.constant 1 : index
    %c0_62 = arith.constant 0 : index
    %c32_63 = arith.constant 32 : index
    %290 = vector.load %arg3[%c1_61, %c0_62, %c32_63] : memref<8x2x64xf32, #tpu.memory_space<vmem>>, vector<1x2x32xf32>
    %291 = vector.shape_cast %290 : vector<1x2x32xf32> to vector<2x32xf32>
    %292 = vector.shape_cast %286 : vector<2x32xf32> to vector<1x2x32xf32>
    tpu.vector_store %arg3[%c1_61, %c0_62, %c32_63], %292 {strides = array<i32>} : memref<8x2x64xf32, #tpu.memory_space<vmem>>, vector<1x2x32xf32>,
    %293 = vector.extract_strided_slice %7 {offsets = [14, 0], sizes = [2, 128], strides = [1, 1]} : vector<16x256xf32> to vector<2x128xf32>
    %294 = vector.extract_strided_slice %7 {offsets = [0, 128], sizes = [2, 128], strides = [1, 1]} : vector<16x256xf32> to vector<2x128xf32>
    %295 = tpu.concatenate %293, %294 in 1 : vector<2x128xf32>, vector<2x128xf32> -> vector<2x256xf32>
    %296 = tpu.concatenate %275, %286 in 1 : vector<2x32xf32>, vector<2x32xf32> -> vector<2x64xf32>
    %c0_64 = arith.constant 0 : index
    %c0_65 = arith.constant 0 : index
    %297 = vector.load %arg2[%c0_64, %c0_65] : memref<64x256xf32, #tpu.memory_space<vmem>>, vector<64x256xf32>
    %cst_66 = arith.constant dense<0.000000e+00> : vector<2x256xf32>
    %298 = tpu.matmul %296, %297, %cst_66 {dimension_numbers = #tpu.dot_dimension_numbers<[1], [0], [0], [1], [0, 0, 1, 1], [], []>} : vector<2x64xf32>, vector<64x256xf32>, vector<2x256xf32> -> vector<2x256xf32>
    %299 = arith.addf %295, %298 : vector<2x256xf32>
    %300 = arith.negf %299 : vector<2x256xf32>
    %301 = math.exp %300 : vector<2x256xf32>
    %cst_67 = arith.constant 1.000000e+00 : f32
    %302 = vector.broadcast %cst_67 : f32 to vector<2x256xf32>
    %303 = arith.addf %302, %301 : vector<2x256xf32>
    %304 = arith.divf %302, %303 : vector<2x256xf32>
    %305 = math.tanh %299 : vector<2x256xf32>
    %306 = vector.extract_strided_slice %304 {offsets = [0, 0], sizes = [2, 128], strides = [1, 1]} : vector<2x256xf32> to vector<2x128xf32>
    %307 = vector.extract_strided_slice %305 {offsets = [0, 0], sizes = [2, 128], strides = [1, 1]} : vector<2x256xf32> to vector<2x128xf32>
    %308 = vector.extract_strided_slice %306 {offsets = [0, 0], sizes = [2, 32], strides = [1, 1]} : vector<2x128xf32> to vector<2x32xf32>
    %309 = vector.extract_strided_slice %306 {offsets = [0, 32], sizes = [2, 32], strides = [1, 1]} : vector<2x128xf32> to vector<2x32xf32>
    %310 = vector.extract_strided_slice %307 {offsets = [0, 64], sizes = [2, 32], strides = [1, 1]} : vector<2x128xf32> to vector<2x32xf32>
    %311 = vector.extract_strided_slice %306 {offsets = [0, 96], sizes = [2, 32], strides = [1, 1]} : vector<2x128xf32> to vector<2x32xf32>
    %312 = arith.mulf %309, %273 : vector<2x32xf32>
    %313 = arith.mulf %308, %310 : vector<2x32xf32>
    %314 = arith.addf %312, %313 : vector<2x32xf32>
    %315 = math.tanh %314 : vector<2x32xf32>
    %316 = arith.mulf %311, %315 : vector<2x32xf32>
    %317 = vector.extract_strided_slice %304 {offsets = [0, 128], sizes = [2, 128], strides = [1, 1]} : vector<2x256xf32> to vector<2x128xf32>
    %318 = vector.extract_strided_slice %305 {offsets = [0, 128], sizes = [2, 128], strides = [1, 1]} : vector<2x256xf32> to vector<2x128xf32>
    %319 = vector.extract_strided_slice %317 {offsets = [0, 0], sizes = [2, 32], strides = [1, 1]} : vector<2x128xf32> to vector<2x32xf32>
    %320 = vector.extract_strided_slice %317 {offsets = [0, 32], sizes = [2, 32], strides = [1, 1]} : vector<2x128xf32> to vector<2x32xf32>
    %321 = vector.extract_strided_slice %318 {offsets = [0, 64], sizes = [2, 32], strides = [1, 1]} : vector<2x128xf32> to vector<2x32xf32>
    %322 = vector.extract_strided_slice %317 {offsets = [0, 96], sizes = [2, 32], strides = [1, 1]} : vector<2x128xf32> to vector<2x32xf32>
    %323 = arith.mulf %320, %284 : vector<2x32xf32>
    %324 = arith.mulf %319, %321 : vector<2x32xf32>
    %325 = arith.addf %323, %324 : vector<2x32xf32>
    %326 = math.tanh %325 : vector<2x32xf32>
    %327 = arith.mulf %322, %326 : vector<2x32xf32>
    %c7_68 = arith.constant 7 : index
    %c0_69 = arith.constant 0 : index
    %c0_70 = arith.constant 0 : index
    %328 = vector.load %arg3[%c7_68, %c0_69, %c0_70] : memref<8x2x64xf32, #tpu.memory_space<vmem>>, vector<1x2x32xf32>
    %329 = vector.shape_cast %328 : vector<1x2x32xf32> to vector<2x32xf32>
    %330 = vector.shape_cast %316 : vector<2x32xf32> to vector<1x2x32xf32>
    tpu.vector_store %arg3[%c7_68, %c0_69, %c0_70], %330 {strides = array<i32>} : memref<8x2x64xf32, #tpu.memory_space<vmem>>, vector<1x2x32xf32>,
    %c0_71 = arith.constant 0 : index
    %c0_72 = arith.constant 0 : index
    %c32_73 = arith.constant 32 : index
    %331 = vector.load %arg3[%c0_71, %c0_72, %c32_73] : memref<8x2x64xf32, #tpu.memory_space<vmem>>, vector<1x2x32xf32>
    %332 = vector.shape_cast %331 : vector<1x2x32xf32> to vector<2x32xf32>
    %333 = vector.shape_cast %327 : vector<2x32xf32> to vector<1x2x32xf32>
    tpu.vector_store %arg3[%c0_71, %c0_72, %c32_73], %333 {strides = array<i32>} : memref<8x2x64xf32, #tpu.memory_space<vmem>>, vector<1x2x32xf32>,
    %334 = tpu.concatenate %316, %327 in 1 : vector<2x32xf32>, vector<2x32xf32> -> vector<2x64xf32>
    %c0_74 = arith.constant 0 : index
    %c0_75 = arith.constant 0 : index
    %335 = vector.load %arg4[%c0_74, %c0_75] : memref<2x64xf32, #tpu.memory_space<vmem>>, vector<2x64xf32>
    tpu.vector_store %arg4[%c0_74, %c0_75], %334 {strides = array<i32>} : memref<2x64xf32, #tpu.memory_space<vmem>>, vector<2x64xf32>,
    return
  }
}

</mosaic_0001>

<bundles_post_ra>
// kernel: lstm_encoder_forward.1
= control target key start
LH: loop header
LB: loop body
LE: loop exit
PB: predicated region body
PF: predicated region fallthrough
CT: control target
= control target key end

     0   :  { %v1732_v2 = vmov 0   ;;  %v1733_v12 = vmov 0.0   ;;  %s2232_s0 = inlined_call_operand.vmem [shape: s32[16,1], index: 0, kind: input, shape index: {}]   ;;  %s2233_s1 = inlined_call_operand.vmem [shape: f32[128,256], index: 1, kind: input, shape index: {}]   ;;  %s2234_s2 = inlined_call_operand.vmem [shape: f32[64,256], index: 2, kind: input, shape index: {}]   ;;  %s2235_s3 = inlined_call_operand.vmem [shape: f32[8,2,64], index: 3, kind: output, shape index: {0}]   ;;  %s2236_s4 = inlined_call_operand.hbm [shape: f32[2,64], index: 4, kind: output, shape index: {1}]  }
   0x1   :  { %v17_v0 = vld [vmem:[%s2232_s0] sm:$0xff]  ;;  %v34_v1 = vld [vmem:[%s2233_s1 + $0x8] sm:$0xff]  ;;  %1579 = vset.pattern.permute.xlu0 %v1732_v2  ;;  %v36_v4 = vld [vmem:[%s2233_s1 + $0x18] sm:$0xff]  ;;  %129 = vmatprep.mubr.f32.mxu0 %v1733_v12 }
   0x2   :  { %v18_v3 = vld [vmem:[%s2232_s0 + $0x8] sm:$0xff]  ;;  %v33_v5 = vld [vmem:[%s2233_s1] sm:$0xff]  ;;  %v35_v6 = vld [vmem:[%s2233_s1 + $0x10] sm:$0xff]  ;;  %22 = vperm.xlu0 %1579, %v17_v0   ;;  %v1429_v7 = vpack.c.bf16 %v36_v4, %v34_v1  ;;  %294 = vmatprep.mubr.f32.mxu1 %v1733_v12 }
   0x3   :  { %v1431_v8 = vpack.c.bf16 %v35_v6, %v33_v5  ;;  %v38_v9 = vld [vmem:[%s2233_s1 + $0x28] sm:$0xff]  ;;  %v40_v10 = vld [vmem:[%s2233_s1 + $0x38] sm:$0xff]  ;;  %v37_v11 = vld [vmem:[%s2233_s1 + $0x20] sm:$0xff] }
   0x4   :  { %v1433_v13 = vpack.c.bf16 %v40_v10, %v38_v9  ;;  %v39_v14 = vld [vmem:[%s2233_s1 + $0x30] sm:$0xff]  ;;  %v42_v15 = vld [vmem:[%s2233_s1 + $0x48] sm:$0xff]  ;;  %v44_v16 = vld [vmem:[%s2233_s1 + $0x58] sm:$0xff]  ;;  %1430 = vmatprep.subr.bf16.mxu0 %v1429_v7 }
   0x5   :  { %1432 = vmatpush1.bf16.msra.mxu0 %v1431_v8  ;;  %v1435_v17 = vpack.c.bf16 %v39_v14, %v37_v11  ;;  %v1437_v18 = vpack.c.bf16 %v44_v16, %v42_v15  ;;  %v41_v19 = vld [vmem:[%s2233_s1 + $0x40] sm:$0xff]  ;;  %v43_v20 = vld [vmem:[%s2233_s1 + $0x50] sm:$0xff]  ;;  %v46_v21 = vld [vmem:[%s2233_s1 + $0x68] sm:$0xff] }
   0x6   :  { %25 = vperm.xlu0 %1579, %v18_v3   ;;  %1434 = vmatprep.subr.bf16.mxu0 %v1433_v13  ;;  %v48_v22 = vld [vmem:[%s2233_s1 + $0x78] sm:$0xff]  ;;  %v1439_v23 = vpack.c.bf16 %v43_v20, %v41_v19  ;;  %v45_v25 = vld [vmem:[%s2233_s1 + $0x60] sm:$0xff]  ;;  %v47_v26 = vld [vmem:[%s2233_s1 + $0x70] sm:$0xff] }
   0x7   :  { %v1441_v24 = vpack.c.bf16 %v48_v22, %v46_v21  ;;  %v50_v27 = vld [vmem:[%s2233_s1 + $0x88] sm:$0xff]  ;;  %v52_v28 = vld [vmem:[%s2233_s1 + $0x98] sm:$0xff] }
   0x9   :  { %1436 = vmatpush1.bf16.msra.mxu0 %v1435_v17 }
   0xa   :  { %1438 = vmatprep.subr.bf16.mxu0 %v1437_v18 }
   0xb   :  { %10 = vsyncpa [#allocation3], 0  ;;  %v1443_v29 = vpack.c.bf16 %v47_v26, %v45_v25  ;;  %v1445_v30 = vpack.c.bf16 %v52_v28, %v50_v27  ;;  %v49_v31 = vld [vmem:[%s2233_s1 + $0x80] sm:$0xff]  ;;  %v51_v32 = vld [vmem:[%s2233_s1 + $0x90] sm:$0xff]  ;;  %v19_v52 = vlaneseq  ;;  %v1734_v55 = vmov 1.0   ;;  %s1736_s0 = smov 32  }
   0xc   :  { %v54_v33 = vld [vmem:[%s2233_s1 + $0xa8] sm:$0xff]  ;;  %v56_v34 = vld [vmem:[%s2233_s1 + $0xb8] sm:$0xff]  ;;  %v1447_v35 = vpack.c.bf16 %v51_v32, %v49_v31  ;;  %v53_v37 = vld [vmem:[%s2233_s1 + $0xa0] sm:$0xff]  ;;  %vm197_vm2 = vcmask 254976   ;;  %vm204_vm3 = vcmask 517376   ;;  %vm208_vm4 = vcmask 261120  }
   0xd   :  { %1440 = vmatpush1.bf16.msra.mxu0 %v1439_v23  ;;  %v1449_v36 = vpack.c.bf16 %v56_v34, %v54_v33  ;;  %v55_v38 = vld [vmem:[%s2233_s1 + $0xb0] sm:$0xff]  ;;  %v58_v39 = vld [vmem:[%s2233_s1 + $0xc8] sm:$0xff]  ;;  %v60_v40 = vld [vmem:[%s2233_s1 + $0xd8] sm:$0xff]  ;;  %v20_v53 = vand.u32 127, %v19_v52  ;;  %vm226_vm5 = vcmask 523264   ;;  %vm368_vm6 = vcmask 257026  }
   0xe   :  { %1442 = vmatprep.subr.bf16.mxu0 %v1441_v24  ;;  %v1451_v41 = vpack.c.bf16 %v55_v38, %v53_v37  ;;  %v1453_v42 = vpack.c.bf16 %v60_v40, %v58_v39  ;;  %v57_v43 = vld [vmem:[%s2233_s1 + $0xc0] sm:$0xff]  ;;  %v59_v44 = vld [vmem:[%s2233_s1 + $0xd0] sm:$0xff]  ;;  %v62_v45 = vld [vmem:[%s2233_s1 + $0xe8] sm:$0xff]  ;;  %vm375_vm7 = vcmask 519426   ;;  %vm536_vm8 = vcmask 259076   ;;  %s1737_s9 = smov [#allocation2]  }
   0xf   :  { %v64_v46 = vld [vmem:[%s2233_s1 + $0xf8] sm:$0xff]  ;;  %v1455_v47 = vpack.c.bf16 %v59_v44, %v57_v43  ;;  %v61_v49 = vld [vmem:[%s2233_s1 + $0xe0] sm:$0xff]  ;;  %v63_v50 = vld [vmem:[%s2233_s1 + $0xf0] sm:$0xff]  ;;  %s1735_s1 = smov 64   ;;  %vm543_vm9 = vcmask 521476   ;;  %vm704_vm10 = vcmask 261126  }
  0x10   :  { %v1457_v48 = vpack.c.bf16 %v64_v46, %v62_v45  ;;  %v1459_v51 = vpack.c.bf16 %v63_v50, %v61_v49  ;;  %v211_v19 = vld [vmem:[%s2234_s2 + $0x8] sm:$0xff]  ;;  %v213_v20 = vld [vmem:[%s2234_s2 + $0x18] sm:$0xff]  ;;  %v210_v21 = vld [vmem:[%s2234_s2] sm:$0xff]  ;;  %vm711_vm11 = vcmask 523526   ;;  %s1378_s10 = sshll.u32 %s1737_s9, 4  ;;  %vm1368_vm12 = vcmask 523270   ;;  %s1379_s10 = int_to_ptr.vmem [resolvable:$true] %s1378_s10 }
  0x11   :  { %1444 = vmatpush1.bf16.msra.mxu0 %v1443_v29  ;;  %v1907_v22 = vpack.c.bf16 %v213_v20, %v211_v19  ;;  %v212_v23 = vld [vmem:[%s2234_s2 + $0x10] sm:$0xff]  ;;  %v215_v24 = vld [vmem:[%s2234_s2 + $0x28] sm:$0xff]  ;;  %v217_v25 = vld [vmem:[%s2234_s2 + $0x38] sm:$0xff]  ;;  %p1713_p1 = scmp.lt.s32.totalorder %s1379_s10, %s1379_s10 }
  0x12   :  { %1446 = vmatprep.subr.bf16.mxu0 %v1445_v30  ;;  %v1918_v26 = vpack.c.bf16 %v212_v23, %v210_v21  ;;  %v1920_v27 = vpack.c.bf16 %v217_v25, %v215_v24  ;;  %v214_v28 = vld [vmem:[%s2234_s2 + $0x20] sm:$0xff]  ;;  %v216_v29 = vld [vmem:[%s2234_s2 + $0x30] sm:$0xff]  ;;  %v219_v33 = vld [vmem:[%s2234_s2 + $0x48] sm:$0xff] }
  0x13   :  { %1462 = vmatprep.subr.bf16.mxu1 %v1907_v22  ;;  %v1932_v31 = vpack.c.bf16 %v216_v29, %v214_v28  ;;  %v221_v34 = vld [vmem:[%s2234_s2 + $0x58] sm:$0xff]  ;;  %v220_v37 = vld [vmem:[%s2234_s2 + $0x50] sm:$0xff]  ;;  %v223_v39 = vld [vmem:[%s2234_s2 + $0x68] sm:$0xff] }
  0x14   :  { %1464 = vmatpush1.bf16.msra.mxu1 %v1918_v26  ;;  %v225_v40 = vld [vmem:[%s2234_s2 + $0x78] sm:$0xff]  ;;  %v224_v43 = vld [vmem:[%s2234_s2 + $0x70] sm:$0xff] }
  0x15   :  { %1448 = vmatpush1.bf16.msra.mxu0 %v1447_v35  ;;  %1466 = vmatprep.subr.bf16.mxu1 %v1920_v27  ;;  %v1946_v35 = vpack.c.bf16 %v221_v34, %v219_v33 }
  0x16   :  { %1450 = vmatprep.subr.bf16.mxu0 %v1449_v36  ;;  %v218_v36 = vld [vmem:[%s2234_s2 + $0x40] sm:$0xff] }
  0x17   :  { %v1954_v38 = vpack.c.bf16 %v220_v37, %v218_v36 }
  0x18   :  { %1468 = vmatpush1.bf16.msra.mxu1 %v1932_v31 }
  0x19   :  { %1452 = vmatpush1.bf16.msra.mxu0 %v1451_v41  ;;  %1470 = vmatprep.subr.bf16.mxu1 %v1946_v35  ;;  %v222_v41 = vld [vmem:[%s2234_s2 + $0x60] sm:$0xff] }
  0x1a   :  { %1454 = vmatprep.subr.bf16.mxu0 %v1453_v42  ;;  %v1968_v42 = vpack.c.bf16 %v225_v40, %v223_v39  ;;  %v1974_v44 = vpack.c.bf16 %v224_v43, %v222_v41 }
  0x1c   :  { %1472 = vmatpush1.bf16.msra.mxu1 %v1954_v38 }
  0x1d   :  { %1456 = vmatpush1.bf16.msra.mxu0 %v1455_v47  ;;  %1474 = vmatprep.subr.bf16.mxu1 %v1968_v42 }
  0x1e   :  { %1458 = vmatprep.subr.bf16.mxu0 %v1457_v48 }
  0x20   :  { %1476 = vmatpush1.bf16.msra.mxu1 %v1974_v44 }
  0x21   :  { %1460 = vmatpush1.bf16.msra.mxu0 %v1459_v51  ;;  %1478 = vmatprep.subr.bf16.mxu1 %v1907_v22 }
  0x22   :  { %1494 = vmatprep.subr.bf16.mxu0 %v1907_v22 }
  0x81   :  { %v23_v54 = vpop.permute.xlu0 %22 }
  0x82   :  { %vm27_vm0 = vcmp.eq.s32.totalorder %v23_v54, %v20_v53 }
  0x83   :  { %1390 = vmatmul.mubr.msk.f32.vlgmr.msra.gmra.mrb[0].mxu0 %vm27_vm0, %v1734_v55 }
  0x84   :  { %135 = vmatprep.mubr.f32.mxu0 %v1733_v12  ;;  %1496 = vmatpush1.bf16.msra.mxu0 %v1918_v26 }
  0x85   :  { %v26_v56 = vpop.permute.xlu0 %25  ;;  %1498 = vmatprep.subr.bf16.mxu0 %v1920_v27 }
  0x86   :  { %vm28_vm1 = vcmp.eq.s32.totalorder %v26_v56, %v20_v53 }
  0x87   :  { %1391 = vmatmul.mubr.msk.f32.gmra.mrb[2].mxu0 %vm28_vm1, %v1734_v55 }
  0x88   :  { %630 = vmatprep.mubr.f32.mxu0 %v1733_v12  ;;  %1500 = vmatpush1.bf16.msra.mxu0 %v1932_v31 }
  0x89   :  { %1502 = vmatprep.subr.bf16.mxu0 %v1946_v35 }
  0x8c   :  { %1504 = vmatpush1.bf16.msra.mxu0 %v1954_v38 }
  0x8d   :  { %1506 = vmatprep.subr.bf16.mxu0 %v1968_v42 }
  0x90   :  { %1508 = vmatpush1.bf16.msra.mxu0 %v1974_v44 }
  0x91   :  { %1526 = vmatprep.subr.bf16.mxu0 %v1907_v22 }
 0x156   :  { %v1869_v57 = vpop.f32.mrb[0].mxu0 }
 0x157   :  { %1580 = vtanh.f32 %v1869_v57  ;;  %v1872_v58 = vpop.f32.mrb[1].mxu0  ;;  %v1392_v0 = vmul.f32 -1.442695, %v1869_v57 }
 0x15a   :  { %v1874_v59 = vpop.f32.mrb[2].mxu0 }
 0x15b   :  { %v1876_v60 = vpop.f32.mrb[3].mxu0 }
 0x15c   :  { %v1879_v61 = vrot.slane %v1876_v60, 6  ;;  %v206_v55 = vrot.slane %v1876_v60, 2 }
 0x15e   :  { %1582 = vtanh.f32 %v1879_v61  ;;  %v1393_v1 = vmul.f32 -1.442695, %v1879_v61 }
 0x15f   :  { %1584 = vpow2.f32 %v1392_v0 }
 0x160   :  { %1586 = vpow2.f32 %v1393_v1 }
 0x161   :  { %v1581_v62 = vpop.eup %1580 }
 0x162   :  { %161 = vrot.lane.b32.xlu1 %v1581_v62, %s1735_s1 }
 0x168   :  { %v1583_v63 = vpop.eup %1582 }
 0x169   :  { %178 = vrot.lane.b32.xlu1 %v1583_v63, %s1735_s1  ;;  %v1585_v2 = vpop.eup %1584 }
 0x16a   :  { %v151_v3 = vadd.f32 1.0, %v1585_v2  ;;  %v1587_v4 = vpop.eup %1586 }
 0x16b   :  { %v152_v5 = vadd.f32 1.0, %v1587_v4 }
 0x16c   :  { %1588 = vrcp.f32 %v151_v3 }
 0x16d   :  { %1590 = vrcp.f32 %v152_v5 }
 0x176   :  { %v1886_v6 = vpop.eup %1588 }
 0x177   :  { %v1591_v9 = vpop.eup %1590  ;;  %v159_v13 = vmul.f32 0.0, %v1886_v6 }
 0x178   :  { %v176_v16 = vmul.f32 0.0, %v1591_v9 }
 0x1d4   :  { %v162_v7 = vpop.permute.xlu1 %161 }
 0x1d5   :  { %v164_v8 = vmul.f32 %v1886_v6, %v162_v7 }
 0x1d7   :  { %166 = vrot.lane.b32.xlu0 %v164_v8, %s1736_s0 }
 0x1db   :  { %v179_v10 = vpop.permute.xlu1 %178 }
 0x1dc   :  { %v181_v11 = vmul.f32 %v1591_v9, %v179_v10 }
 0x1de   :  { %183 = vrot.lane.b32.xlu1 %v181_v11, %s1736_s0 }
 0x249   :  { %v167_v14 = vpop.permute.xlu0 %166 }
 0x24a   :  { %v1892_v15 = vadd.f32 %v167_v14, %v159_v13 }
 0x24c   :  { %1592 = vtanh.f32 %v1892_v15 }
 0x250   :  { %v184_v17 = vpop.permute.xlu1 %183 }
 0x251   :  { %v1895_v18 = vadd.f32 %v184_v17, %v176_v16  ;;  %v324_v16 = vrot.slane %v1892_v15, 6 }
 0x253   :  { %1594 = vtanh.f32 %v1895_v18  ;;  %v344_v17 = vrot.slane %v1895_v18, 6 }
 0x256   :  { %v1593_v30 = vpop.eup %1592 }
 0x257   :  { %172 = vrot.lane.b32.xlu0 %v1593_v30, %s1735_s1 }
 0x25d   :  { %v1595_v32 = vpop.eup %1594 }
 0x25e   :  { %189 = vrot.lane.b32.xlu1 %v1595_v32, %s1735_s1 }
 0x2c9   :  { %v173_v45 = vpop.permute.xlu0 %172 }
 0x2ca   :  { %v175_v46 = vmul.f32 %v1886_v6, %v173_v45 }
 0x2cc   :  { %194 = vrot.lane.b32.xlu0 %v175_v46, %s1736_s0 }
 0x2d0   :  { %v190_v47 = vpop.permute.xlu1 %189 }
 0x2d1   :  { %v192_v48 = vmul.f32 %v1591_v9, %v190_v47 }
 0x2d3   :  { %200 = vrot.lane.b32.xlu1 %v192_v48, %s1735_s1 }
 0x33e   :  { %v195_v49 = vpop.permute.xlu0 %194 }
 0x33f   :  { %198 = vst.msk [vmem:[%s2235_s3] sm:$0x3] %vm197_vm2, %v195_v49 }
 0x345   :  { %v201_v50 = vpop.permute.xlu1 %200 }
 0x346   :  { %1394 = vst.msk [vmem:[%s2235_s3 + $0xe] sm:$0x3] %vm204_vm3, %v201_v50  ;;  %v209_v51 = vsel %vm208_vm4, %v195_v49, %v201_v50 }
 0x347   :  { %1395 = vmatmul.mubr.msk.f32.vlgmr.msra.gmra.mrb[0].mxu1 %vm226_vm5, %v209_v51 }
 0x348   :  { %1480 = vmatpush1.bf16.msra.mxu1 %v1918_v26  ;;  %462 = vmatprep.mubr.f32.mxu1 %v1733_v12 }
 0x349   :  { %1482 = vmatprep.subr.bf16.mxu1 %v1920_v27 }
 0x34c   :  { %1484 = vmatpush1.bf16.msra.mxu1 %v1932_v31 }
 0x34d   :  { %1486 = vmatprep.subr.bf16.mxu1 %v1946_v35 }
 0x350   :  { %1488 = vmatpush1.bf16.msra.mxu1 %v1954_v38 }
 0x351   :  { %1490 = vmatprep.subr.bf16.mxu1 %v1968_v42 }
 0x354   :  { %1492 = vmatpush1.bf16.msra.mxu1 %v1974_v44 }
 0x355   :  { %1510 = vmatprep.subr.bf16.mxu1 %v1907_v22 }
 0x41a   :  { %v296_v52 = vpop.f32.mrb[0].mxu1 }
 0x41b   :  { %v303_v53 = vrot.slane %v296_v52, 6  ;;  %v298_v54 = vpop.f32.mrb[1].mxu1 }
 0x41c   :  { %v304_v56 = vrot.slane %v298_v54, 6 }
 0x41d   :  { %v307_v62 = vadd.f32 %v303_v53, %v1869_v57 }
 0x41e   :  { %v308_v63 = vadd.f32 %v304_v56, %v206_v55 }
 0x41f   :  { %1596 = vtanh.f32 %v307_v62  ;;  %v1396_v2 = vmul.f32 -1.442695, %v307_v62 }
 0x420   :  { %1598 = vtanh.f32 %v308_v63  ;;  %v1397_v3 = vmul.f32 -1.442695, %v308_v63 }
 0x421   :  { %1600 = vpow2.f32 %v1396_v2 }
 0x422   :  { %1602 = vpow2.f32 %v1397_v3 }
 0x429   :  { %v1597_v0 = vpop.eup %1596 }
 0x42a   :  { %v1599_v1 = vpop.eup %1598  ;;  %328 = vrot.lane.b32.xlu0 %v1597_v0, %s1735_s1 }
 0x42b   :  { %348 = vrot.lane.b32.xlu1 %v1599_v1, %s1735_s1  ;;  %v1601_v4 = vpop.eup %1600 }
 0x42c   :  { %v1603_v5 = vpop.eup %1602  ;;  %v315_v6 = vadd.f32 1.0, %v1601_v4 }
 0x42d   :  { %v316_v7 = vadd.f32 1.0, %v1603_v5 }
 0x42e   :  { %1604 = vrcp.f32 %v315_v6 }
 0x42f   :  { %1606 = vrcp.f32 %v316_v7 }
 0x438   :  { %v1605_v8 = vpop.eup %1604 }
 0x439   :  { %v1607_v10 = vpop.eup %1606  ;;  %v326_v19 = vmul.f32 %v1605_v8, %v324_v16 }
 0x43a   :  { %v346_v21 = vmul.f32 %v1607_v10, %v344_v17 }
 0x49c   :  { %v329_v9 = vpop.permute.xlu0 %328 }
 0x49d   :  { %v331_v11 = vmul.f32 %v1605_v8, %v329_v9  ;;  %v349_v13 = vpop.permute.xlu1 %348 }
 0x49e   :  { %v351_v14 = vmul.f32 %v1607_v10, %v349_v13 }
 0x49f   :  { %333 = vrot.lane.b32.xlu0 %v331_v11, %s1736_s0 }
 0x4a0   :  { %353 = vrot.lane.b32.xlu1 %v351_v14, %s1736_s0 }
 0x511   :  { %v334_v20 = vpop.permute.xlu0 %333 }
 0x512   :  { %v2014_v23 = vadd.f32 %v334_v20, %v326_v19  ;;  %v354_v24 = vpop.permute.xlu1 %353 }
 0x513   :  { %v2016_v25 = vadd.f32 %v354_v24, %v346_v21 }
 0x514   :  { %1608 = vtanh.f32 %v2014_v23  ;;  %v492_v2 = vrot.slane %v2014_v23, 6 }
 0x515   :  { %1610 = vtanh.f32 %v2016_v25  ;;  %v512_v3 = vrot.slane %v2016_v25, 6 }
 0x51e   :  { %v1609_v28 = vpop.eup %1608 }
 0x51f   :  { %v1611_v29 = vpop.eup %1610  ;;  %339 = vrot.lane.b32.xlu0 %v1609_v28, %s1735_s1 }
 0x520   :  { %359 = vrot.lane.b32.xlu1 %v1611_v29, %s1735_s1 }
 0x591   :  { %v340_v15 = vpop.permute.xlu0 %339 }
 0x592   :  { %v342_v18 = vmul.f32 %v1605_v8, %v340_v15  ;;  %v360_v30 = vpop.permute.xlu1 %359 }
 0x593   :  { %v362_v32 = vmul.f32 %v1607_v10, %v360_v30 }
 0x594   :  { %364 = vrot.lane.b32.xlu0 %v342_v18, %s1736_s0 }
 0x595   :  { %371 = vrot.lane.b32.xlu1 %v362_v32, %s1735_s1 }
 0x606   :  { %v365_v33 = vpop.permute.xlu0 %364 }
 0x607   :  { %1398 = vst.msk [vmem:[%s2235_s3] sm:$0xc] %vm368_vm6, %v365_v33  ;;  %v372_v34 = vpop.permute.xlu1 %371 }
 0x608   :  { %1399 = vst.msk [vmem:[%s2235_s3 + $0xa] sm:$0xc] %vm375_vm7, %v372_v34  ;;  %v377_v36 = vsel %vm208_vm4, %v365_v33, %v372_v34 }
 0x609   :  { %v395_v37 = vrot.slane %v377_v36, 2 }
 0x60b   :  { %1400 = vmatmul.mubr.msk.f32.vlgmr.msra.gmra.mrb[2].mxu1 %vm226_vm5, %v395_v37 }
 0x60c   :  { %1512 = vmatpush1.bf16.msra.mxu1 %v1918_v26  ;;  %801 = vmatprep.mubr.f32.mxu1 %v1733_v12 }
 0x60d   :  { %1514 = vmatprep.subr.bf16.mxu1 %v1920_v27 }
 0x610   :  { %1516 = vmatpush1.bf16.msra.mxu1 %v1932_v31 }
 0x611   :  { %1518 = vmatprep.subr.bf16.mxu1 %v1946_v35 }
 0x614   :  { %1520 = vmatpush1.bf16.msra.mxu1 %v1954_v38 }
 0x615   :  { %1522 = vmatprep.subr.bf16.mxu1 %v1968_v42 }
 0x618   :  { %1524 = vmatpush1.bf16.msra.mxu1 %v1974_v44 }
 0x619   :  { %1542 = vmatprep.subr.bf16.mxu1 %v1907_v22 }
 0x6de   :  { %v464_v39 = vpop.f32.mrb[2].mxu1 }
 0x6df   :  { %v471_v40 = vrot.slane %v464_v39, 4  ;;  %v466_v41 = vpop.f32.mrb[3].mxu1 }
 0x6e0   :  { %v472_v43 = vrot.slane %v466_v41, 4 }
 0x6e1   :  { %v475_v45 = vadd.f32 %v471_v40, %v1869_v57 }
 0x6e2   :  { %v476_v46 = vadd.f32 %v472_v43, %v1879_v61 }
 0x6e3   :  { %1612 = vtanh.f32 %v475_v45  ;;  %v1401_v49 = vmul.f32 -1.442695, %v475_v45 }
 0x6e4   :  { %1614 = vtanh.f32 %v476_v46  ;;  %v1402_v50 = vmul.f32 -1.442695, %v476_v46 }
 0x6e5   :  { %1616 = vpow2.f32 %v1401_v49 }
 0x6e6   :  { %1618 = vpow2.f32 %v1402_v50 }
 0x6ed   :  { %v1613_v47 = vpop.eup %1612 }
 0x6ee   :  { %v1615_v48 = vpop.eup %1614  ;;  %496 = vrot.lane.b32.xlu0 %v1613_v47, %s1735_s1 }
 0x6ef   :  { %516 = vrot.lane.b32.xlu1 %v1615_v48, %s1735_s1  ;;  %v1617_v51 = vpop.eup %1616 }
 0x6f0   :  { %v1619_v52 = vpop.eup %1618  ;;  %v483_v53 = vadd.f32 1.0, %v1617_v51 }
 0x6f1   :  { %v484_v54 = vadd.f32 1.0, %v1619_v52 }
 0x6f2   :  { %1620 = vrcp.f32 %v483_v53 }
 0x6f3   :  { %1622 = vrcp.f32 %v484_v54 }
 0x6fc   :  { %v1621_v56 = vpop.eup %1620 }
 0x6fd   :  { %v1623_v62 = vpop.eup %1622  ;;  %v494_v4 = vmul.f32 %v1621_v56, %v492_v2 }
 0x6fe   :  { %v514_v6 = vmul.f32 %v1623_v62, %v512_v3 }
 0x760   :  { %v497_v61 = vpop.permute.xlu0 %496 }
 0x761   :  { %v499_v63 = vmul.f32 %v1621_v56, %v497_v61  ;;  %v517_v0 = vpop.permute.xlu1 %516 }
 0x762   :  { %v519_v1 = vmul.f32 %v1623_v62, %v517_v0 }
 0x763   :  { %501 = vrot.lane.b32.xlu0 %v499_v63, %s1736_s0 }
 0x764   :  { %521 = vrot.lane.b32.xlu1 %v519_v1, %s1736_s0 }
 0x7d5   :  { %v502_v5 = vpop.permute.xlu0 %501 }
 0x7d6   :  { %v2051_v7 = vadd.f32 %v502_v5, %v494_v4  ;;  %v522_v8 = vpop.permute.xlu1 %521  ;;  %v714_v4 = vrot.slane %v1872_v58, 6 }
 0x7d7   :  { %v2053_v9 = vadd.f32 %v522_v8, %v514_v6 }
 0x7d8   :  { %1624 = vtanh.f32 %v2051_v7  ;;  %v660_v45 = vrot.slane %v2051_v7, 6 }
 0x7d9   :  { %1626 = vtanh.f32 %v2053_v9  ;;  %v680_v46 = vrot.slane %v2053_v9, 6 }
 0x7e2   :  { %v1625_v10 = vpop.eup %1624 }
 0x7e3   :  { %v1627_v11 = vpop.eup %1626  ;;  %507 = vrot.lane.b32.xlu0 %v1625_v10, %s1735_s1 }
 0x7e4   :  { %527 = vrot.lane.b32.xlu1 %v1627_v11, %s1735_s1 }
 0x855   :  { %v508_v13 = vpop.permute.xlu0 %507 }
 0x856   :  { %v510_v14 = vmul.f32 %v1621_v56, %v508_v13  ;;  %v528_v16 = vpop.permute.xlu1 %527 }
 0x857   :  { %v530_v17 = vmul.f32 %v1623_v62, %v528_v16 }
 0x858   :  { %532 = vrot.lane.b32.xlu0 %v510_v14, %s1736_s0 }
 0x859   :  { %539 = vrot.lane.b32.xlu1 %v530_v17, %s1735_s1 }
 0x8ca   :  { %v533_v19 = vpop.permute.xlu0 %532 }
 0x8cb   :  { %1403 = vst.msk [vmem:[%s2235_s3] sm:$0x30] %vm536_vm8, %v533_v19  ;;  %v540_v20 = vpop.permute.xlu1 %539 }
 0x8cc   :  { %1404 = vst.msk [vmem:[%s2235_s3 + $0x6] sm:$0x30] %vm543_vm9, %v540_v20  ;;  %v545_v21 = vsel %vm208_vm4, %v533_v19, %v540_v20 }
 0x8cd   :  { %v563_v23 = vrot.slane %v545_v21, 4 }
 0x8cf   :  { %1405 = vmatmul.mubr.msk.f32.vlgmr.msra.gmra.mrb[4].mxu0 %vm226_vm5, %v563_v23 }
 0x8d0   :  { %1528 = vmatpush1.bf16.msra.mxu0 %v1918_v26  ;;  %960 = vmatprep.mubr.f32.mxu0 %v1733_v12 }
 0x8d1   :  { %1530 = vmatprep.subr.bf16.mxu0 %v1920_v27 }
 0x8d4   :  { %1532 = vmatpush1.bf16.msra.mxu0 %v1932_v31 }
 0x8d5   :  { %1534 = vmatprep.subr.bf16.mxu0 %v1946_v35 }
 0x8d8   :  { %1536 = vmatpush1.bf16.msra.mxu0 %v1954_v38 }
 0x8d9   :  { %1538 = vmatprep.subr.bf16.mxu0 %v1968_v42 }
 0x8dc   :  { %1540 = vmatpush1.bf16.msra.mxu0 %v1974_v44 }
 0x8dd   :  { %1558 = vmatprep.subr.bf16.mxu0 %v1907_v22 }
 0x9a2   :  { %v632_v24 = vpop.f32.mrb[4].mxu0 }
 0x9a3   :  { %v639_v25 = vrot.slane %v632_v24, 2  ;;  %v634_v28 = vpop.f32.mrb[5].mxu0 }
 0x9a4   :  { %v640_v29 = vrot.slane %v634_v28, 2 }
 0x9a5   :  { %v643_v15 = vadd.f32 %v639_v25, %v1869_v57 }
 0x9a6   :  { %v644_v18 = vadd.f32 %v640_v29, %v206_v55 }
 0x9a7   :  { %1628 = vtanh.f32 %v643_v15  ;;  %v1406_v33 = vmul.f32 -1.442695, %v643_v15 }
 0x9a8   :  { %1630 = vtanh.f32 %v644_v18  ;;  %v1407_v34 = vmul.f32 -1.442695, %v644_v18 }
 0x9a9   :  { %1632 = vpow2.f32 %v1406_v33 }
 0x9aa   :  { %1634 = vpow2.f32 %v1407_v34 }
 0x9b1   :  { %v1629_v30 = vpop.eup %1628 }
 0x9b2   :  { %v1631_v32 = vpop.eup %1630  ;;  %664 = vrot.lane.b32.xlu0 %v1629_v30, %s1735_s1 }
 0x9b3   :  { %684 = vrot.lane.b32.xlu1 %v1631_v32, %s1735_s1  ;;  %v1633_v22 = vpop.eup %1632 }
 0x9b4   :  { %v1635_v36 = vpop.eup %1634  ;;  %v651_v37 = vadd.f32 1.0, %v1633_v22 }
 0x9b5   :  { %v652_v39 = vadd.f32 1.0, %v1635_v36 }
 0x9b6   :  { %1636 = vrcp.f32 %v651_v37 }
 0x9b7   :  { %1638 = vrcp.f32 %v652_v39 }
 0x9c0   :  { %v1637_v57 = vpop.eup %1636 }
 0x9c1   :  { %v1639_v55 = vpop.eup %1638  ;;  %v662_v47 = vmul.f32 %v1637_v57, %v660_v45 }
 0x9c2   :  { %v682_v49 = vmul.f32 %v1639_v55, %v680_v46 }
 0xa24   :  { %v665_v60 = vpop.permute.xlu0 %664 }
 0xa25   :  { %v667_v40 = vmul.f32 %v1637_v57, %v665_v60  ;;  %v685_v41 = vpop.permute.xlu1 %684 }
 0xa26   :  { %v687_v43 = vmul.f32 %v1639_v55, %v685_v41 }
 0xa27   :  { %669 = vrot.lane.b32.xlu0 %v667_v40, %s1736_s0 }
 0xa28   :  { %689 = vrot.lane.b32.xlu1 %v687_v43, %s1736_s0 }
 0xa99   :  { %v670_v48 = vpop.permute.xlu0 %669 }
 0xa9a   :  { %v2089_v50 = vadd.f32 %v670_v48, %v662_v47  ;;  %v690_v51 = vpop.permute.xlu1 %689  ;;  %v874_v48 = vrot.slane %v1872_v58, 2 }
 0xa9b   :  { %v2091_v52 = vadd.f32 %v690_v51, %v682_v49 }
 0xa9c   :  { %1640 = vtanh.f32 %v2089_v50  ;;  %v825_v29 = vrot.slane %v2089_v50, 6 }
 0xa9d   :  { %1642 = vtanh.f32 %v2091_v52  ;;  %v845_v15 = vrot.slane %v2091_v52, 6 }
 0xaa6   :  { %v1641_v53 = vpop.eup %1640 }
 0xaa7   :  { %v1643_v54 = vpop.eup %1642  ;;  %675 = vrot.lane.b32.xlu0 %v1641_v53, %s1735_s1 }
 0xaa8   :  { %695 = vrot.lane.b32.xlu1 %v1643_v54, %s1735_s1 }
 0xb19   :  { %v676_v56 = vpop.permute.xlu0 %675 }
 0xb1a   :  { %v678_v61 = vmul.f32 %v1637_v57, %v676_v56  ;;  %v696_v62 = vpop.permute.xlu1 %695 }
 0xb1b   :  { %v698_v63 = vmul.f32 %v1639_v55, %v696_v62 }
 0xb1c   :  { %700 = vrot.lane.b32.xlu0 %v678_v61, %s1736_s0 }
 0xb1d   :  { %707 = vrot.lane.b32.xlu1 %v698_v63, %s1735_s1 }
 0xb8e   :  { %v701_v0 = vpop.permute.xlu0 %700 }
 0xb8f   :  { %1408 = vst.msk [vmem:[%s2235_s3] sm:$0xc0] %vm704_vm10, %v701_v0  ;;  %v708_v1 = vpop.permute.xlu1 %707 }
 0xb90   :  { %1409 = vst.msk [vmem:[%s2235_s3 + $0x2] sm:$0xc0] %vm711_vm11, %v708_v1  ;;  %v716_v2 = vsel %vm208_vm4, %v701_v0, %v708_v1 }
 0xb91   :  { %v734_v3 = vrot.slane %v716_v2, 6 }
 0xb93   :  { %1410 = vmatmul.mubr.msk.f32.vlgmr.msra.gmra.mrb[4].mxu1 %vm226_vm5, %v734_v3 }
 0xb94   :  { %1544 = vmatpush1.bf16.msra.mxu1 %v1918_v26  ;;  %1124 = vmatprep.mubr.f32.mxu1 %v1733_v12 }
 0xb95   :  { %1546 = vmatprep.subr.bf16.mxu1 %v1920_v27 }
 0xb98   :  { %1548 = vmatpush1.bf16.msra.mxu1 %v1932_v31 }
 0xb99   :  { %1550 = vmatprep.subr.bf16.mxu1 %v1946_v35 }
 0xb9c   :  { %1552 = vmatpush1.bf16.msra.mxu1 %v1954_v38 }
 0xb9d   :  { %1554 = vmatprep.subr.bf16.mxu1 %v1968_v42 }
 0xba0   :  { %1556 = vmatpush1.bf16.msra.mxu1 %v1974_v44 }
 0xc66   :  { %v803_v5 = vpop.f32.mrb[4].mxu1 }
 0xc67   :  { %v808_v6 = vadd.f32 %v803_v5, %v1874_v59  ;;  %v805_v7 = vpop.f32.mrb[5].mxu1 }
 0xc68   :  { %v809_v8 = vadd.f32 %v805_v7, %v714_v4 }
 0xc69   :  { %1644 = vtanh.f32 %v808_v6  ;;  %v1411_v11 = vmul.f32 -1.442695, %v808_v6 }
 0xc6a   :  { %1646 = vtanh.f32 %v809_v8  ;;  %v1412_v13 = vmul.f32 -1.442695, %v809_v8 }
 0xc6b   :  { %1648 = vpow2.f32 %v1411_v11 }
 0xc6c   :  { %1650 = vpow2.f32 %v1412_v13 }
 0xc73   :  { %v1645_v9 = vpop.eup %1644 }
 0xc74   :  { %v1647_v10 = vpop.eup %1646  ;;  %829 = vrot.lane.b32.xlu0 %v1645_v9, %s1735_s1 }
 0xc75   :  { %849 = vrot.lane.b32.xlu1 %v1647_v10, %s1735_s1  ;;  %v1649_v14 = vpop.eup %1648 }
 0xc76   :  { %v1651_v16 = vpop.eup %1650  ;;  %v816_v17 = vadd.f32 1.0, %v1649_v14 }
 0xc77   :  { %v817_v19 = vadd.f32 1.0, %v1651_v16 }
 0xc78   :  { %1652 = vrcp.f32 %v816_v17 }
 0xc79   :  { %1654 = vrcp.f32 %v817_v19 }
 0xc82   :  { %v1653_v20 = vpop.eup %1652 }
 0xc83   :  { %v1655_v23 = vpop.eup %1654  ;;  %v827_v18 = vmul.f32 %v1653_v20, %v825_v29 }
 0xc84   :  { %v847_v32 = vmul.f32 %v1655_v23, %v845_v15 }
 0xce6   :  { %v830_v21 = vpop.permute.xlu0 %829 }
 0xce7   :  { %v832_v24 = vmul.f32 %v1653_v20, %v830_v21  ;;  %v850_v25 = vpop.permute.xlu1 %849 }
 0xce8   :  { %v852_v28 = vmul.f32 %v1655_v23, %v850_v25 }
 0xce9   :  { %834 = vrot.lane.b32.xlu0 %v832_v24, %s1736_s0 }
 0xcea   :  { %854 = vrot.lane.b32.xlu1 %v852_v28, %s1736_s0 }
 0xd5b   :  { %v835_v30 = vpop.permute.xlu0 %834 }
 0xd5c   :  { %v2127_v33 = vadd.f32 %v835_v30, %v827_v18  ;;  %v855_v34 = vpop.permute.xlu1 %854 }
 0xd5d   :  { %v2129_v22 = vadd.f32 %v855_v34, %v847_v32 }
 0xd5e   :  { %1656 = vtanh.f32 %v2127_v33  ;;  %v990_v63 = vrot.slane %v2127_v33, 6 }
 0xd5f   :  { %1658 = vtanh.f32 %v2129_v22  ;;  %v1010_v0 = vrot.slane %v2129_v22, 6 }
 0xd68   :  { %v1657_v36 = vpop.eup %1656 }
 0xd69   :  { %v1659_v37 = vpop.eup %1658  ;;  %840 = vrot.lane.b32.xlu0 %v1657_v36, %s1735_s1 }
 0xd6a   :  { %860 = vrot.lane.b32.xlu1 %v1659_v37, %s1735_s1 }
 0xddb   :  { %v841_v39 = vpop.permute.xlu0 %840 }
 0xddc   :  { %v843_v57 = vmul.f32 %v1653_v20, %v841_v39  ;;  %v861_v60 = vpop.permute.xlu1 %860 }
 0xddd   :  { %v863_v55 = vmul.f32 %v1655_v23, %v861_v60 }
 0xdde   :  { %865 = vrot.lane.b32.xlu0 %v843_v57, %s1736_s0 }
 0xddf   :  { %870 = vrot.lane.b32.xlu1 %v863_v55, %s1735_s1 }
 0xe50   :  { %v866_v40 = vpop.permute.xlu0 %865 }
 0xe51   :  { %1413 = vst.msk [vmem:[%s2235_s3 + $0x8] sm:$0x3] %vm197_vm2, %v866_v40  ;;  %v871_v41 = vpop.permute.xlu1 %870 }
 0xe52   :  { %1414 = vst.msk [vmem:[%s2235_s3 + $0x6] sm:$0x3] %vm204_vm3, %v871_v41  ;;  %v876_v43 = vsel %vm208_vm4, %v866_v40, %v871_v41 }
 0xe53   :  { %1415 = vmatmul.mubr.msk.f32.vlgmr.msra.gmra.mrb[6].mxu0 %vm226_vm5, %v876_v43 }
 0xe54   :  { %1560 = vmatpush1.bf16.msra.mxu0 %v1918_v26  ;;  %1288 = vmatprep.mubr.f32.mxu0 %v1733_v12 }
 0xe55   :  { %1562 = vmatprep.subr.bf16.mxu0 %v1920_v27 }
 0xe58   :  { %1564 = vmatpush1.bf16.msra.mxu0 %v1932_v31 }
 0xe59   :  { %1566 = vmatprep.subr.bf16.mxu0 %v1946_v35 }
 0xe5c   :  { %1568 = vmatpush1.bf16.msra.mxu0 %v1954_v38 }
 0xe5d   :  { %1570 = vmatprep.subr.bf16.mxu0 %v1968_v42 }
 0xe60   :  { %1572 = vmatpush1.bf16.msra.mxu0 %v1974_v44 }
 0xf26   :  { %v962_v45 = vpop.f32.mrb[6].mxu0 }
 0xf27   :  { %v969_v46 = vrot.slane %v962_v45, 6  ;;  %v964_v47 = vpop.f32.mrb[7].mxu0 }
 0xf28   :  { %v970_v26 = vrot.slane %v964_v47, 6 }
 0xf29   :  { %v973_v12 = vadd.f32 %v969_v46, %v1874_v59 }
 0xf2a   :  { %v974_v27 = vadd.f32 %v970_v26, %v874_v48 }
 0xf2b   :  { %1660 = vtanh.f32 %v973_v12  ;;  %v1416_v38 = vmul.f32 -1.442695, %v973_v12 }
 0xf2c   :  { %1662 = vtanh.f32 %v974_v27  ;;  %v1417_v42 = vmul.f32 -1.442695, %v974_v27 }
 0xf2d   :  { %1664 = vpow2.f32 %v1416_v38 }
 0xf2e   :  { %1666 = vpow2.f32 %v1417_v42 }
 0xf35   :  { %v1661_v31 = vpop.eup %1660 }
 0xf36   :  { %v1663_v35 = vpop.eup %1662  ;;  %994 = vrot.lane.b32.xlu0 %v1661_v31, %s1735_s1 }
 0xf37   :  { %1014 = vrot.lane.b32.xlu1 %v1663_v35, %s1735_s1  ;;  %v1665_v44 = vpop.eup %1664 }
 0xf38   :  { %v1667_v49 = vpop.eup %1666  ;;  %v981_v50 = vadd.f32 1.0, %v1665_v44 }
 0xf39   :  { %v982_v51 = vadd.f32 1.0, %v1667_v49 }
 0xf3a   :  { %1668 = vrcp.f32 %v981_v50 }
 0xf3b   :  { %1670 = vrcp.f32 %v982_v51 }
 0xf44   :  { %v1669_v52 = vpop.eup %1668 }
 0xf45   :  { %v1671_v54 = vpop.eup %1670  ;;  %v992_v1 = vmul.f32 %v1669_v52, %v990_v63 }
 0xf46   :  { %v1012_v3 = vmul.f32 %v1671_v54, %v1010_v0 }
 0xfa8   :  { %v995_v53 = vpop.permute.xlu0 %994 }
 0xfa9   :  { %v997_v56 = vmul.f32 %v1669_v52, %v995_v53  ;;  %v1015_v61 = vpop.permute.xlu1 %1014 }
 0xfaa   :  { %v1017_v62 = vmul.f32 %v1671_v54, %v1015_v61 }
 0xfab   :  { %999 = vrot.lane.b32.xlu0 %v997_v56, %s1736_s0 }
 0xfac   :  { %1019 = vrot.lane.b32.xlu1 %v1017_v62, %s1736_s0 }
0x101d   :  { %v1000_v2 = vpop.permute.xlu0 %999 }
0x101e   :  { %v1002_v5 = vadd.f32 %v1000_v2, %v992_v1  ;;  %v1020_v6 = vpop.permute.xlu1 %1019 }
0x101f   :  { %v1022_v7 = vadd.f32 %v1020_v6, %v1012_v3 }
0x1020   :  { %1672 = vtanh.f32 %v1002_v5  ;;  %v1154_v40 = vrot.slane %v1002_v5, 6 }
0x1021   :  { %1674 = vtanh.f32 %v1022_v7  ;;  %v1174_v41 = vrot.slane %v1022_v7, 6 }
0x102a   :  { %v1673_v8 = vpop.eup %1672 }
0x102b   :  { %v1675_v9 = vpop.eup %1674  ;;  %1005 = vrot.lane.b32.xlu0 %v1673_v8, %s1735_s1 }
0x102c   :  { %1025 = vrot.lane.b32.xlu1 %v1675_v9, %s1735_s1 }
0x109d   :  { %v1006_v10 = vpop.permute.xlu0 %1005 }
0x109e   :  { %v1008_v11 = vmul.f32 %v1669_v52, %v1006_v10  ;;  %v1026_v13 = vpop.permute.xlu1 %1025 }
0x109f   :  { %v1028_v14 = vmul.f32 %v1671_v54, %v1026_v13 }
0x10a0   :  { %1030 = vrot.lane.b32.xlu0 %v1008_v11, %s1736_s0 }
0x10a1   :  { %1035 = vrot.lane.b32.xlu1 %v1028_v14, %s1735_s1 }
0x1112   :  { %v1031_v16 = vpop.permute.xlu0 %1030 }
0x1113   :  { %1418 = vst.msk [vmem:[%s2235_s3 + $0x8] sm:$0xc] %vm368_vm6, %v1031_v16  ;;  %v1036_v17 = vpop.permute.xlu1 %1035 }
0x1114   :  { %1419 = vst.msk [vmem:[%s2235_s3 + $0x2] sm:$0xc] %vm375_vm7, %v1036_v17  ;;  %v1039_v19 = vsel %vm208_vm4, %v1031_v16, %v1036_v17 }
0x1115   :  { %v1057_v20 = vrot.slane %v1039_v19, 2 }
0x1117   :  { %1420 = vmatmul.mubr.msk.f32.vlgmr.msra.gmra.mrb[6].mxu1 %vm226_vm5, %v1057_v20 }
0x11ea   :  { %v1126_v21 = vpop.f32.mrb[6].mxu1 }
0x11eb   :  { %v1133_v23 = vrot.slane %v1126_v21, 4  ;;  %v1128_v24 = vpop.f32.mrb[7].mxu1 }
0x11ec   :  { %v1134_v25 = vrot.slane %v1128_v24, 4 }
0x11ed   :  { %v1137_v28 = vadd.f32 %v1133_v23, %v1874_v59 }
0x11ee   :  { %v1138_v29 = vadd.f32 %v1134_v25, %v714_v4 }
0x11ef   :  { %1676 = vtanh.f32 %v1137_v28  ;;  %v1421_v30 = vmul.f32 -1.442695, %v1137_v28 }
0x11f0   :  { %1678 = vtanh.f32 %v1138_v29  ;;  %v1422_v32 = vmul.f32 -1.442695, %v1138_v29 }
0x11f1   :  { %1680 = vpow2.f32 %v1421_v30 }
0x11f2   :  { %1682 = vpow2.f32 %v1422_v32 }
0x11f9   :  { %v1677_v15 = vpop.eup %1676 }
0x11fa   :  { %v1679_v18 = vpop.eup %1678  ;;  %1158 = vrot.lane.b32.xlu0 %v1677_v15, %s1735_s1 }
0x11fb   :  { %1178 = vrot.lane.b32.xlu1 %v1679_v18, %s1735_s1  ;;  %v1681_v33 = vpop.eup %1680 }
0x11fc   :  { %v1683_v34 = vpop.eup %1682  ;;  %v1145_v22 = vadd.f32 1.0, %v1681_v33 }
0x11fd   :  { %v1146_v36 = vadd.f32 1.0, %v1683_v34 }
0x11fe   :  { %1684 = vrcp.f32 %v1145_v22 }
0x11ff   :  { %1686 = vrcp.f32 %v1146_v36 }
0x1208   :  { %v1685_v37 = vpop.eup %1684 }
0x1209   :  { %v1687_v39 = vpop.eup %1686  ;;  %v1156_v43 = vmul.f32 %v1685_v37, %v1154_v40 }
0x120a   :  { %v1176_v46 = vmul.f32 %v1687_v39, %v1174_v41 }
0x126c   :  { %v1159_v4 = vpop.permute.xlu0 %1158 }
0x126d   :  { %v1161_v57 = vmul.f32 %v1685_v37, %v1159_v4  ;;  %v1179_v60 = vpop.permute.xlu1 %1178 }
0x126e   :  { %v1181_v55 = vmul.f32 %v1687_v39, %v1179_v60 }
0x126f   :  { %1163 = vrot.lane.b32.xlu0 %v1161_v57, %s1736_s0 }
0x1270   :  { %1183 = vrot.lane.b32.xlu1 %v1181_v55, %s1736_s0 }
0x12e1   :  { %v1164_v45 = vpop.permute.xlu0 %1163 }
0x12e2   :  { %v1166_v47 = vadd.f32 %v1164_v45, %v1156_v43  ;;  %v1184_v26 = vpop.permute.xlu1 %1183 }
0x12e3   :  { %v1186_v12 = vadd.f32 %v1184_v26, %v1176_v46 }
0x12e4   :  { %1688 = vtanh.f32 %v1166_v47  ;;  %v1318_v13 = vrot.slane %v1166_v47, 6 }
0x12e5   :  { %1690 = vtanh.f32 %v1186_v12  ;;  %v1338_v14 = vrot.slane %v1186_v12, 6 }
0x12ee   :  { %v1689_v27 = vpop.eup %1688 }
0x12ef   :  { %v1691_v31 = vpop.eup %1690  ;;  %1169 = vrot.lane.b32.xlu0 %v1689_v27, %s1735_s1 }
0x12f0   :  { %1189 = vrot.lane.b32.xlu1 %v1691_v31, %s1735_s1 }
0x1361   :  { %v1170_v35 = vpop.permute.xlu0 %1169 }
0x1362   :  { %v1172_v38 = vmul.f32 %v1685_v37, %v1170_v35  ;;  %v1190_v42 = vpop.permute.xlu1 %1189 }
0x1363   :  { %v1192_v44 = vmul.f32 %v1687_v39, %v1190_v42 }
0x1364   :  { %1194 = vrot.lane.b32.xlu0 %v1172_v38, %s1736_s0 }
0x1365   :  { %1199 = vrot.lane.b32.xlu1 %v1192_v44, %s1735_s1 }
0x13d6   :  { %v1195_v49 = vpop.permute.xlu0 %1194 }
0x13d7   :  { %1423 = vst.msk [vmem:[%s2235_s3 + $0x8] sm:$0x30] %vm536_vm8, %v1195_v49  ;;  %v1200_v50 = vpop.permute.xlu1 %1199 }
0x13d8   :  { %1424 = vst.msk [vmem:[%s2235_s3 - $0x2] sm:$0x30] %vm543_vm9, %v1200_v50  ;;  %v1203_v51 = vsel %vm208_vm4, %v1195_v49, %v1200_v50 }
0x13d9   :  { %v1221_v52 = vrot.slane %v1203_v51, 4 }
0x13db   :  { %1425 = vmatmul.mubr.msk.f32.vlgmr.msra.gmra.mrb[8].mxu0 %vm226_vm5, %v1221_v52 }
0x14ae   :  { %v1290_v53 = vpop.f32.mrb[8].mxu0 }
0x14af   :  { %v1297_v54 = vrot.slane %v1290_v53, 2  ;;  %v1292_v56 = vpop.f32.mrb[9].mxu0 }
0x14b0   :  { %v1298_v61 = vrot.slane %v1292_v56, 2 }
0x14b1   :  { %v1301_v62 = vadd.f32 %v1297_v54, %v1874_v59 }
0x14b2   :  { %v1302_v63 = vadd.f32 %v1298_v61, %v874_v48 }
0x14b3   :  { %1692 = vtanh.f32 %v1301_v62  ;;  %v1426_v2 = vmul.f32 -1.442695, %v1301_v62 }
0x14b4   :  { %1694 = vtanh.f32 %v1302_v63  ;;  %v1427_v3 = vmul.f32 -1.442695, %v1302_v63 }
0x14b5   :  { %1696 = vpow2.f32 %v1426_v2 }
0x14b6   :  { %1698 = vpow2.f32 %v1427_v3 }
0x14bd   :  { %v1693_v0 = vpop.eup %1692 }
0x14be   :  { %v1695_v1 = vpop.eup %1694  ;;  %1322 = vrot.lane.b32.xlu0 %v1693_v0, %s1735_s1 }
0x14bf   :  { %1342 = vrot.lane.b32.xlu1 %v1695_v1, %s1735_s1  ;;  %v1697_v5 = vpop.eup %1696 }
0x14c0   :  { %v1699_v6 = vpop.eup %1698  ;;  %v1309_v7 = vadd.f32 1.0, %v1697_v5 }
0x14c1   :  { %v1310_v8 = vadd.f32 1.0, %v1699_v6 }
0x14c2   :  { %1700 = vrcp.f32 %v1309_v7 }
0x14c3   :  { %1702 = vrcp.f32 %v1310_v8 }
0x14cc   :  { %v1701_v58 = vpop.eup %1700 }
0x14cd   :  { %v1703_v48 = vpop.eup %1702  ;;  %v1320_v16 = vmul.f32 %v1701_v58, %v1318_v13 }
0x14ce   :  { %v1340_v19 = vmul.f32 %v1703_v48, %v1338_v14 }
0x1530   :  { %v1323_v59 = vpop.permute.xlu0 %1322 }
0x1531   :  { %v1325_v9 = vmul.f32 %v1701_v58, %v1323_v59  ;;  %v1343_v10 = vpop.permute.xlu1 %1342 }
0x1532   :  { %v1345_v11 = vmul.f32 %v1703_v48, %v1343_v10 }
0x1533   :  { %1327 = vrot.lane.b32.xlu0 %v1325_v9, %s1736_s0 }
0x1534   :  { %1347 = vrot.lane.b32.xlu1 %v1345_v11, %s1736_s0 }
0x15a5   :  { %v1328_v17 = vpop.permute.xlu0 %1327 }
0x15a6   :  { %v1330_v20 = vadd.f32 %v1328_v17, %v1320_v16  ;;  %v1348_v21 = vpop.permute.xlu1 %1347 }
0x15a7   :  { %v1350_v23 = vadd.f32 %v1348_v21, %v1340_v19 }
0x15a8   :  { %1704 = vtanh.f32 %v1330_v20 }
0x15a9   :  { %1706 = vtanh.f32 %v1350_v23 }
0x15b2   :  { %v1705_v24 = vpop.eup %1704 }
0x15b3   :  { %v1707_v25 = vpop.eup %1706  ;;  %1333 = vrot.lane.b32.xlu0 %v1705_v24, %s1735_s1 }
0x15b4   :  { %1353 = vrot.lane.b32.xlu1 %v1707_v25, %s1735_s1 }
0x1625   :  { %v1334_v28 = vpop.permute.xlu0 %1333 }
0x1626   :  { %v1336_v29 = vmul.f32 %v1701_v58, %v1334_v28  ;;  %v1354_v15 = vpop.permute.xlu1 %1353 }
0x1627   :  { %v1356_v18 = vmul.f32 %v1703_v48, %v1354_v15 }
0x1628   :  { %1358 = vrot.lane.b32.xlu0 %v1336_v29, %s1736_s0 }
0x1629   :  { %1363 = vrot.lane.b32.xlu1 %v1356_v18, %s1735_s1  ;;  %s1708_s1 = scalar_lea.vmem %s1379_s10, 32 }
0x162a   :  { %p1709_p0 = scmp.ne.s32.totalorder %s1379_s10, %s1708_s1  ;;  %p1714_p2 = scmp.lt.s32.totalorder %s1708_s1, %s1708_s1 }
0x162c   :  { %p1715_p3 = por %p1714_p2, %p1713_p1 }
0x162e   :  { %p1716_p4 = pnand %p1715_p3, %p1709_p0 }
0x169a   :  { %v1359_v30 = vpop.permute.xlu0 %1358 }
0x169b   :  { %1428 = vst.msk [vmem:[%s2235_s3 + $0x8] sm:$0xc0] %vm704_vm10, %v1359_v30  ;;  %v1364_v32 = vpop.permute.xlu1 %1363 }
0x169c   :  { %1366 = vst.msk [vmem:[%s2235_s3 - $0x6] sm:$0xc0] %vm711_vm11, %v1364_v32  ;;  %v1367_v33 = vsel %vm208_vm4, %v1359_v30, %v1364_v32 }
0x169d   :  { %1369 = vst.msk [vmem:[#allocation2 - $0x6] sm:$0xc0] %vm1368_vm12, %v1367_v33 }
0x169e   :  { %1719 = shalt.err (!%p1716_p4)
}
0x169f   :  { %s1720_s16 = scalar_lea.hbm %s2236_s4, 32 }
0x16a0   :  { %p1721_p5 = scmp.ne.s32.totalorder %s2236_s4, %s1720_s16  ;;  %p1724_p6 = scmp.lt.u32.totalorder %s1720_s16, %s2236_s4 }
0x16a2   :  { %p1726_p7 = pnand %p1724_p6, %p1721_p5 }
0x16a4   :  { %1729 = shalt.err (!%p1726_p7)
}
0x16a5   :  { %1381 = dma.vmem_to_hbm [thread:$0]  %s1379_s10, 32, %s2236_s4, [#allocation3]  }
0x16a6   :  { %1730 = dma.done.wait [#allocation3], 32  }
0x16a7   :  { %1731 = vsyncadd [#allocation3], 4294967264 }
0x16a8   :  { %1387 = vsyncpa [#allocation3], 1 }

</bundles_post_ra>
